<compile_context>
chip_gen: v6e
topology: v6e:2x2x1
jax: 0.10.0
libtpu: 0.0.40
codegen_flags: <defaults>
</compile_context>

<pallas_src>
import jax
import jax.numpy as jnp
from jax.experimental import pallas as pl
from jax.experimental.pallas import tpu as pltpu


# ----------------------------- glue (plain JAX) -----------------------------

def apply_2d_rotation(x, rotation):
    """Rotate the last two (spatial) dims by 0/90/180/270 deg (matches torch)."""
    if rotation == 0:
        return x
    elif rotation == 90:
        # flip_upside_down(spatial_transpose(x))
        return jnp.flip(jnp.swapaxes(x, -2, -1), axis=-2)
    elif rotation == 180:
        # flip_left_right(flip_upside_down(x))
        return jnp.flip(x, axis=(-2, -1))
    elif rotation == 270:
        # spatial_transpose(flip_upside_down(x))
        return jnp.swapaxes(jnp.flip(x, axis=-2), -2, -1)
    raise ValueError(rotation)


def tranform_shape(x, n_support):
    """(ways, n_views, C, H, W) -> (ways*n_views, C, H, W), support first."""
    ways, n_views = x.shape[0], x.shape[1]
    shots = n_support
    x_support = x[:, :shots].reshape((ways * shots,) + x.shape[-3:])
    x_query = x[:, shots:].reshape((ways * (n_views - shots),) + x.shape[-3:])
    return jnp.concatenate([x_support, x_query], axis=0)


def im2col_3x3_same(x):
    """NCHW (B,C,H,W) -> patches (B, H*W, C*9) for a 3x3 SAME conv."""
    B, C, H, W = x.shape
    xp = jnp.pad(x, ((0, 0), (0, 0), (1, 1), (1, 1)))
    cols = [xp[:, :, dy:dy + H, dx:dx + W] for dy in range(3) for dx in range(3)]
    p = jnp.stack(cols, axis=2)            # (B, C, 9, H, W)
    p = p.transpose(0, 3, 4, 1, 2)         # (B, H, W, C, 9)
    return p.reshape(B, H * W, C * 9)


def _round_up(n, m):
    return ((n + m - 1) // m) * m


def _pad_axis(x, size, axis):
    pad = size - x.shape[axis]
    if pad <= 0:
        return x
    widths = [(0, 0)] * x.ndim
    widths[axis] = (0, pad)
    return jnp.pad(x, widths)


def _pick_tile_imgs(B):
    """Images per grid tile: multiple of 8 (dense sublanes) and >=2 grid tiles
    when possible (v7x megacore); otherwise fall back to one full-array tile."""
    for cand in (8, 16, 32, 64):
        if B % cand == 0 and B // cand >= 2:
            return cand
    return B


# ------------------------------- Pallas kernel -------------------------------

def _fused_feature_classifier_kernel(patches_ref, wconv_ref, bconv_ref,
                                     pool_ref, wcls_ref, out_ref):
    # patches_ref: (TILE_M, CKp) bf16   -- TILE_IMGS images x HW rows each
    # wconv_ref:   (CKp, Fp)    bf16    -- conv weight (zero-padded)
    # bconv_ref:   (1, Fp)      f32
    # pool_ref:    (TILE_IMGS, TILE_M) f32 -- block-diagonal 1/HW average pool
    # wcls_ref:    (Fp, NCp)    f32     -- pre-normalized, pre-scaled classifier
    # out_ref:     (TILE_IMGS, NCp) f32
    #
    # conv-as-matmul over im2col patches (bf16 MXU, f32 accumulate)
    h = jnp.dot(patches_ref[...], wconv_ref[...],
                preferred_element_type=jnp.float32)          # (TILE_M, Fp)
    # bias + ReLU in f32 (VPU)
    h = jnp.maximum(h + bconv_ref[...], 0.0)
    # per-image global average pool as a single block-diagonal matmul (MXU)
    feat = jnp.dot(pool_ref[...], h,
                   preferred_element_type=jnp.float32)       # (TILE_IMGS, Fp)
    # distLinear feature normalization (eps=1e-5 on the feature norm only)
    nrm = jnp.sqrt(jnp.sum(feat * feat, axis=1, keepdims=True))
    feat_n = feat / (nrm + 1e-5)
    # batched cosine-classifier matmul; weight norm + scale already folded in
    scores = jnp.dot(feat_n, wcls_ref[...],
                     preferred_element_type=jnp.float32)     # (TILE_IMGS, NCp)
    out_ref[...] = scores.astype(out_ref.dtype)


def fused_feature_classifier(patches, wconv_mat, bconv, wcls, scale_factor):
    """patches: (B, HW, CK) f32; wconv_mat: (CK, F); bconv: (1, F);
    wcls: (NC, F).  Returns scores (B, NC) f32."""
    B, HW, CK = patches.shape
    F = wconv_mat.shape[1]
    NC = wcls.shape[0]

    # lane-dense padded dims
    CKp = _round_up(CK, 128)
    Fp = _round_up(F, 128)
    NCp = _round_up(NC, 128)

    tile_imgs = _pick_tile_imgs(B)
    tile_m = tile_imgs * HW
    grid = (B // tile_imgs,)

    # ---- wrapper-side prep (runs once, outside the grid) ----
    # patches: pad contraction dim, flatten batch*HW, cast to bf16 for the MXU.
    patches_p = _pad_axis(patches, CKp, axis=2).reshape(B * HW, CKp)
    patches_p = patches_p.astype(jnp.bfloat16)
    # conv weight / bias zero-padded.
    wconv_p = _pad_axis(_pad_axis(wconv_mat, CKp, 0), Fp, 1).astype(jnp.bfloat16)
    bconv_p = _pad_axis(bconv.astype(jnp.float32), Fp, 1)
    # hoisted distLinear weight norm + scale fold (loop-invariant).
    wcls_n = wcls / jnp.linalg.norm(wcls, axis=1, keepdims=True)   # per-class L2
    wcls_t = (scale_factor * wcls_n.T).astype(jnp.float32)         # (F, NC)
    wcls_p = _pad_axis(_pad_axis(wcls_t, Fp, 0), NCp, 1)
    # block-diagonal average-pool matrix (exact 1/HW weights), same every tile.
    row_img = jnp.arange(tile_m, dtype=jnp.int32) // HW
    pool = (jnp.arange(tile_imgs, dtype=jnp.int32)[:, None] == row_img[None, :])
    pool = pool.astype(jnp.float32) * (1.0 / HW)                    # (TI, TILE_M)

    out = pl.pallas_call(
        _fused_feature_classifier_kernel,
        out_shape=jax.ShapeDtypeStruct((B, NCp), jnp.float32),
        grid_spec=pltpu.PrefetchScalarGridSpec(
            num_scalar_prefetch=0,
            grid=grid,
            in_specs=[
                pl.BlockSpec((tile_m, CKp), lambda i: (i, 0)),
                pl.BlockSpec((CKp, Fp), lambda i: (0, 0)),
                pl.BlockSpec((1, Fp), lambda i: (0, 0)),
                pl.BlockSpec((tile_imgs, tile_m), lambda i: (0, 0)),
                pl.BlockSpec((Fp, NCp), lambda i: (0, 0)),
            ],
            out_specs=pl.BlockSpec((tile_imgs, NCp), lambda i: (i, 0)),
        ),
        compiler_params=pltpu.CompilerParams(
            dimension_semantics=("parallel",)),
    )(patches_p, wconv_p, bconv_p, pool, wcls_p)
    return out[:, :NC]                                              # (B, NC)


# ------------------------------ module forward -------------------------------

def selfsupervision_rot_forward(x, n_support, wconv, bconv, wcls):
    """x: (ways, n_views, C, H, W). Returns scores (4*ways*n_views, num_classes)."""
    tx = tranform_shape(x, n_support)
    x_90 = tranform_shape(apply_2d_rotation(x, 90), n_support)
    x_180 = tranform_shape(apply_2d_rotation(x, 180), n_support)
    x_270 = tranform_shape(apply_2d_rotation(x, 270), n_support)
    X = jnp.concatenate([tx, x_90, x_180, x_270], axis=0)           # (B,C,H,W)

    patches = im2col_3x3_same(X)                                    # (B,HW,C*9)
    F = wconv.shape[0]
    wconv_mat = wconv.reshape(F, -1).T                              # (C*9, F)
    num_classes = wcls.shape[0]
    scale_factor = 2.0 if num_classes <= 200 else 10.0              # distLinear
    return fused_feature_classifier(patches, wconv_mat, bconv, wcls, scale_factor)


if __name__ == "__main__":
    ways, n_views, C, H, W = 2, 4, 4, 16, 16
    n_support = 1
    F = 32                 # feature_extractor.final_feat_dim (synthetic)
    num_classes = 4
    KH = KW = 3

    key = jax.random.PRNGKey(0)
    kx, kw, kb, kc = jax.random.split(key, 4)
    x = jax.random.normal(kx, (ways, n_views, C, H, W), dtype=jnp.float32)

    # deterministic parameter init (synthetic; no checkpoint loading)
    wconv = jax.random.normal(kw, (F, C, KH, KW), dtype=jnp.float32) * 0.1
    bconv = jax.random.normal(kb, (1, F), dtype=jnp.float32) * 0.01
    wcls = jax.random.normal(kc, (num_classes, F), dtype=jnp.float32)

    scores = selfsupervision_rot_forward(x, n_support, wconv, bconv, wcls)
    scores = jax.block_until_ready(scores)
    assert scores.shape == (4 * ways * n_views, num_classes)
    assert bool(jnp.all(jnp.isfinite(scores)))
    print("KERNEL_OK")
</pallas_src>

<mosaic_0001>
module attributes {stable_mosaic.version = 11 : i64} {
  func.func @_fused_feature_classifier_kernel(%arg0: i32, %arg1: memref<2048x128xbf16, #tpu.memory_space<vmem>>, %arg2: memref<128x128xbf16, #tpu.memory_space<vmem>>, %arg3: memref<1x128xf32, #tpu.memory_space<vmem>>, %arg4: memref<8x2048xf32, #tpu.memory_space<vmem>>, %arg5: memref<128x128xf32, #tpu.memory_space<vmem>>, %arg6: memref<8x128xf32, #tpu.memory_space<vmem>>) attributes {dimension_semantics = [#tpu.dimension_semantics<parallel>], iteration_bounds = array<i64: 4>, scalar_prefetch = 0 : i64, scratch_operands = 0 : i64, tpu.core_type = #tpu.core_type<tc>, window_params = [{transform_indices = @transform_0, window_bounds = array<i64: 2048, 128>}, {pipeline_mode = #tpu.pipeline_mode<synchronous>, transform_indices = @transform_1, window_bounds = array<i64: 128, 128>}, {pipeline_mode = #tpu.pipeline_mode<synchronous>, transform_indices = @transform_2, window_bounds = array<i64: 1, 128>}, {pipeline_mode = #tpu.pipeline_mode<synchronous>, transform_indices = @transform_3, window_bounds = array<i64: 8, 2048>}, {pipeline_mode = #tpu.pipeline_mode<synchronous>, transform_indices = @transform_4, window_bounds = array<i64: 128, 128>}, {transform_indices = @transform_5, window_bounds = array<i64: 8, 128>}]} {
    %c0 = arith.constant 0 : index
    %c0_0 = arith.constant 0 : index
    %0 = vector.load %arg1[%c0, %c0_0] : memref<2048x128xbf16, #tpu.memory_space<vmem>>, vector<2048x128xbf16>
    %c0_1 = arith.constant 0 : index
    %c0_2 = arith.constant 0 : index
    %1 = vector.load %arg2[%c0_1, %c0_2] : memref<128x128xbf16, #tpu.memory_space<vmem>>, vector<128x128xbf16>
    %cst = arith.constant dense<0.000000e+00> : vector<2048x128xf32>
    %2 = tpu.matmul %0, %1, %cst {dimension_numbers = #tpu.dot_dimension_numbers<[1], [0], [0], [1], [0, 0, 1, 1], [], []>} : vector<2048x128xbf16>, vector<128x128xbf16>, vector<2048x128xf32> -> vector<2048x128xf32>
    %c0_3 = arith.constant 0 : index
    %c0_4 = arith.constant 0 : index
    %3 = vector.load %arg3[%c0_3, %c0_4] : memref<1x128xf32, #tpu.memory_space<vmem>>, vector<1x128xf32>
    %4 = vector.broadcast %3 : vector<1x128xf32> to vector<2048x128xf32>
    %5 = arith.addf %2, %4 : vector<2048x128xf32>
    %cst_5 = arith.constant 0.000000e+00 : f32
    %6 = vector.broadcast %cst_5 : f32 to vector<2048x128xf32>
    %7 = arith.maximumf %5, %6 : vector<2048x128xf32>
    %c0_6 = arith.constant 0 : index
    %c0_7 = arith.constant 0 : index
    %8 = vector.load %arg4[%c0_6, %c0_7] : memref<8x2048xf32, #tpu.memory_space<vmem>>, vector<8x2048xf32>
    %cst_8 = arith.constant dense<0.000000e+00> : vector<8x128xf32>
    %9 = tpu.matmul %8, %7, %cst_8 {dimension_numbers = #tpu.dot_dimension_numbers<[1], [0], [0], [1], [0, 0, 1, 1], [], []>} : vector<8x2048xf32>, vector<2048x128xf32>, vector<8x128xf32> -> vector<8x128xf32>
    %10 = arith.mulf %9, %9 : vector<8x128xf32>
    %cst_9 = arith.constant dense<0.000000e+00> : vector<8xf32>
    %11 = vector.multi_reduction <add>, %10, %cst_9 [1] : vector<8x128xf32> to vector<8xf32>
    %12 = vector.shape_cast %11 : vector<8xf32> to vector<8x1xf32>
    %13 = math.sqrt %12 : vector<8x1xf32>
    %cst_10 = arith.constant 9.99999974E-6 : f32
    %14 = vector.broadcast %cst_10 : f32 to vector<8x1xf32>
    %15 = arith.addf %13, %14 : vector<8x1xf32>
    %16 = vector.broadcast %15 : vector<8x1xf32> to vector<8x128xf32>
    %17 = arith.divf %9, %16 : vector<8x128xf32>
    %c0_11 = arith.constant 0 : index
    %c0_12 = arith.constant 0 : index
    %18 = vector.load %arg5[%c0_11, %c0_12] : memref<128x128xf32, #tpu.memory_space<vmem>>, vector<128x128xf32>
    %cst_13 = arith.constant dense<0.000000e+00> : vector<8x128xf32>
    %19 = tpu.matmul %17, %18, %cst_13 {dimension_numbers = #tpu.dot_dimension_numbers<[1], [0], [0], [1], [0, 0, 1, 1], [], []>} : vector<8x128xf32>, vector<128x128xf32>, vector<8x128xf32> -> vector<8x128xf32>
    %c0_14 = arith.constant 0 : index
    %c0_15 = arith.constant 0 : index
    %20 = vector.load %arg6[%c0_14, %c0_15] : memref<8x128xf32, #tpu.memory_space<vmem>>, vector<8x128xf32>
    tpu.vector_store %arg6[%c0_14, %c0_15], %19 {strides = array<i32>} : memref<8x128xf32, #tpu.memory_space<vmem>>, vector<8x128xf32>,
    return
  }
  func.func @transform_0(%arg0: i32) -> (i32, i32) {
    %c0_i32 = arith.constant 0 : i32
    %c0_i32_0 = arith.constant 0 : i32
    return %arg0, %c0_i32 : i32, i32
  }
  func.func @transform_1(%arg0: i32) -> (i32, i32) {
    %c0_i32 = arith.constant 0 : i32
    %c0_i32_0 = arith.constant 0 : i32
    %c0_i32_1 = arith.constant 0 : i32
    return %c0_i32, %c0_i32_0 : i32, i32
  }
  func.func @transform_2(%arg0: i32) -> (i32, i32) {
    %c0_i32 = arith.constant 0 : i32
    %c0_i32_0 = arith.constant 0 : i32
    %c0_i32_1 = arith.constant 0 : i32
    return %c0_i32, %c0_i32_0 : i32, i32
  }
  func.func @transform_3(%arg0: i32) -> (i32, i32) {
    %c0_i32 = arith.constant 0 : i32
    %c0_i32_0 = arith.constant 0 : i32
    %c0_i32_1 = arith.constant 0 : i32
    return %c0_i32, %c0_i32_0 : i32, i32
  }
  func.func @transform_4(%arg0: i32) -> (i32, i32) {
    %c0_i32 = arith.constant 0 : i32
    %c0_i32_0 = arith.constant 0 : i32
    %c0_i32_1 = arith.constant 0 : i32
    return %c0_i32, %c0_i32_0 : i32, i32
  }
  func.func @transform_5(%arg0: i32) -> (i32, i32) {
    %c0_i32 = arith.constant 0 : i32
    %c0_i32_0 = arith.constant 0 : i32
    return %arg0, %c0_i32 : i32, i32
  }
}

</mosaic_0001>

<bundles_post_ra>
// kernel: tpu_custom_call.1
= control target key start
LH: loop header
LB: loop body
LE: loop exit
PB: predicated region body
PF: predicated region fallthrough
CT: control target
= control target key end

     0   :  { %10 = vsyncpa [#allocation3], 0  ;;  %s6022_s0 = inlined_call_operand.hbm [shape: bf16[8192,128], index: 0, kind: input, shape index: {}]   ;;  %s6023_s1 = inlined_call_operand.hbm [shape: bf16[128,128], index: 1, kind: input, shape index: {}]   ;;  %s6024_s2 = inlined_call_operand.hbm [shape: f32[1,128], index: 2, kind: input, shape index: {}]   ;;  %s6025_s3 = inlined_call_operand.hbm [shape: f32[8,2048], index: 3, kind: input, shape index: {}]   ;;  %s6026_s4 = inlined_call_operand.hbm [shape: f32[128,128], index: 4, kind: input, shape index: {}]   ;;  %s6027_s5 = inlined_call_operand.hbm [shape: f32[32,128], index: 5, kind: output, shape index: {}]  }
   0x1   :  { %12 = vsyncpa [#allocation3 + $0x1], 0 }
   0x2   :  { %13 = vsyncpa [#allocation6], 0 }
   0x3   :  { %14 = vsyncpa [#allocation9], 0 }
   0x4   :  { %15 = vsyncpa [#allocation4], 0 }
   0x5   :  { %17 = vsyncpa [#allocation4 + $0x1], 0  ;;  %s4903_s18 = smov 0   ;;  %s4905_s19 = smov 0  }
   0x6   :  { %s4907_s20 = smov 0   ;;  %s4909_s21 = smov 0  }
   0x7 LB: > { %s4924_s22 = sadd.s32 4294967295, %s4859_s21   ;;  %s3505_s23 = sadd.s32 4294967294, %s4859_s21   ;;  %s4859_s21 = sphi %s4909_s21, %s6100_s21   ;;  %s4855_s20 = sphi %s4907_s20, %s6099_s20   ;;  %s4851_s19 = sphi %s4905_s19, %s6098_s19   ;;  %s4847_s18 = sphi %s4903_s18, %s6097_s18  }
   0x8   : > { %p43_p0 = scmp.ne.s32.totalorder %s4851_s19, %s4847_s18  ;;  %p6028_p1 = scmp.eq.s32.totalorder %s4924_s22, 0 }
   0x9   : > { %p157_p3 = scmp.eq.s32.totalorder %s3505_s23, 3  ;;  %p3506_p5 = scmp.ge.s32.totalorder %s4859_s21, 1 }
   0xa   : > { %p4933_p4 = por %p6028_p1, %p43_p0  ;;  %p164_p7 = scmp.lt.s32.totalorder %s4859_s21, 5 }
   0xb   : > { %p4938_p6 = por %p157_p3, %p43_p0  ;;  %s4861_s27 = smov [#allocation5]  }
   0xc   : > { %s6033_s24 = scalar_select %p4933_p4, 1, 0 }
   0xd   : > { %s6034_s25 = scalar_select %p4938_p6, 1, 0 }
   0xe   : > { %p4943_p8 = pnand %p3506_p5, %p164_p7  ;;  %s176_s28 = sshll.u32 %s4861_s27, 4  ;;  %s177_s28 = int_to_ptr.vmem [resolvable:$true] %s176_s28 }
   0xf   : > { %s4862_s30 = smov [#allocation8]   ;;  %s4863_s7 = smov [#allocation7]  }
  0x10   : > { %s6035_s26 = scalar_select %p4943_p8, 1, 0 }
  0x11   : > { %p4440_p9 = pneg %p4943_p8  ;;  %s201_s6 = sshll.u32 %s4862_s30, 4  ;;  %s202_s6 = int_to_ptr.vmem [resolvable:$true] %s201_s6 }
  0x12   : > { %s190_s8 = sshll.u32 %s4863_s7, 4  ;;  %s4666_s9 = scalar_lea.vmem %s177_s28, 1024  ;;  %s191_s8 = int_to_ptr.vmem [resolvable:$true] %s190_s8 }
  0x13   : > { %p4951_p10 = pnand %p4440_p9, %p6028_p1  ;;  %p4667_p12 = scmp.ne.s32.totalorder %s177_s28, %s4666_s9 }
  0x14   : > { %p4674_p3 = scmp.lt.s32.totalorder %s177_s28, %s177_s28  ;;  %p4675_p5 = scmp.lt.s32.totalorder %s4666_s9, %s4666_s9 }
  0x15   : > { %p4657_p11 = pneg %p4951_p10 }
  0x16   : > { %p4676_p7 = por %p4675_p5, %p4674_p3 }
  0x17   : > { %p4669_p13 = pnand %p4667_p12, %p4657_p11 }
  0x19   : > { %p4670_p0 = pneg %p4669_p13 }
  0x1b   : > { %p4677_p9 = pnand %p4676_p7, %p4670_p0 }
  0x1d   : > { %4680 = shalt.err (!%p4677_p9)
}
  0x1e   : > { %s6029_s10 = smov 64   ;;  %s4865_s11 = smov 4  }
  0x1f   : > { %4443 = dma.hbm_to_vmem [thread:$0]  (!%p4951_p10), %s6023_s1, 1024, %s177_s28, [#allocation6], %s6029_s10, %s6029_s10, %s4865_s11  }
  0x20   : > { %s4692_s14 = scalar_lea.vmem %s202_s6, 2048  ;;  %p4700_p0 = scmp.lt.s32.totalorder %s202_s6, %s202_s6 }
  0x21   : > { %p4693_p12 = scmp.ne.s32.totalorder %s202_s6, %s4692_s14  ;;  %p4701_p5 = scmp.lt.s32.totalorder %s4692_s14, %s4692_s14 }
  0x23   : > { %p4695_p13 = pnand %p4693_p12, %p4657_p11  ;;  %p4702_p7 = por %p4701_p5, %p4700_p0 }
  0x25   : > { %p4696_p3 = pneg %p4695_p13 }
  0x27   : > { %p4703_p9 = pnand %p4702_p7, %p4696_p3 }
  0x29   : > { %4706 = shalt.err (!%p4703_p9)
}
  0x2a   : > { %4449 = dma.hbm_to_vmem [thread:$0]  (!%p4951_p10), %s6025_s3, 2048, %s202_s6, [#allocation9]  }
  0x2b   : > { %s4718_s17 = scalar_lea.vmem %s191_s8, 16  ;;  %s4725_s23 = scalar_lea.vmem %s191_s8, 32 }
  0x2c   : > { %p4719_p1 = scmp.ne.s32.totalorder %s191_s8, %s4718_s17  ;;  %p4726_p13 = scmp.lt.s32.totalorder %s191_s8, %s191_s8 }
  0x2d   : > { %p4727_p6 = scmp.lt.s32.totalorder %s4725_s23, %s4718_s17 }
  0x2e   : > { %p4721_p2 = pnand %p4719_p1, %p4657_p11 }
  0x2f   : > { %p4728_p0 = por %p4727_p6, %p4726_p13 }
  0x30   : > { %p4722_p12 = pneg %p4721_p2 }
  0x32   : > { %p4729_p3 = pnand %p4728_p0, %p4722_p12 }
  0x34   : > { %4732 = shalt.err (!%p4729_p3)
}
  0x35   : > { %4446 = dma.hbm_to_vmem [thread:$0]  (!%p4951_p10), %s6024_s2, 16, %s191_s8, [#allocation6]  }
  0x36   : > { %s4866_s30 = smov [#allocation10]  }
  0x37   : > { %s211_s6 = sshll.u32 %s4866_s30, 4  ;;  %s212_s6 = int_to_ptr.vmem [resolvable:$true] %s211_s6 }
  0x38   : > { %s4744_s7 = scalar_lea.vmem %s212_s6, 2048  ;;  %p4752_p7 = scmp.lt.s32.totalorder %s212_s6, %s212_s6 }
  0x39   : > { %p4745_p5 = scmp.ne.s32.totalorder %s212_s6, %s4744_s7  ;;  %p4753_p6 = scmp.lt.s32.totalorder %s4744_s7, %s4744_s7 }
  0x3b   : > { %p4747_p1 = pnand %p4745_p5, %p4657_p11  ;;  %p4754_p9 = por %p4753_p6, %p4752_p7 }
  0x3d   : > { %p4748_p2 = pneg %p4747_p1 }
  0x3f   : > { %p4755_p12 = pnand %p4754_p9, %p4748_p2 }
  0x41   : > { %4758 = shalt.err (!%p4755_p12)
}
  0x42   : > { %s4867_s9 = smov 128   ;;  %s4868_s8 = smov 8  }
  0x43   : > { %4452 = dma.hbm_to_vmem [thread:$0]  (!%p4951_p10), %s6026_s4, 2048, %s212_s6, [#allocation9], %s4867_s9, %s4867_s9, %s4868_s8  }
  0x44   : > { %s4993_s14 = sadd.s32 1, %s4859_s21   ;;  %s30_s16 = sadd.s32 1, %s4855_s20 }
  0x45   : > { %s27_s15 = ssub.s32 %s4859_s21, %s4993_s14  ;;  %p37_p13 = scmp.ne.s32.totalorder %s4855_s20, %s4851_s19 }
  0x46   : > { %p28_p11 = scmp.eq.s32.totalorder %s27_s15, 0  ;;  %p38_p0 = scmp.eq.s32.totalorder %s4859_s21, 0 }
  0x47   : > { %p6037_p5 = scmp.eq.s32.totalorder %s4924_s22, 3  ;;  %p4465_p2 = scmp.lt.s32.totalorder %s4859_s21, 4 }
  0x48   : > { %s5002_s17 = scalar_select %p28_p11, %s4855_s20, %s30_s16  }
  0x49   : > { %p39_p3 = por %p38_p0, %p37_p13  ;;  %p5006_p1 = por %p6037_p5, %p37_p13 }
  0x4a   : > { %s225_s29 = sand.u32 1, %s4855_s20   ;;  %s3663_s28 = sshll.u32 %s4859_s21, 14 }
  0x4b   : > { %s6038_s23 = scalar_select %p5006_p1, 1, 0 }
  0x4c   : > { %s3512_s27 = sshll.u32 %s225_s29, 10  ;;  %s5016_s7 = scalar_lea.hbm %s6022_s0, %s3663_s28 }
  0x4d   : > { %s229_s9 = scalar_lea.vmem [#allocation2], %s3512_s27  ;;  %p5020_p10 = pnand %p4465_p2, %p39_p3 }
  0x4e   : > { %s236_s8 = sshll.u32 %s229_s9, 4  ;;  %s5024_s13 = scalar_lea.sflag [#allocation3], %s225_s29  ;;  %s5018_s8 = int_to_ptr.vmem [resolvable:$true] %s236_s8 }
  0x4f   : > { %s4759_s15 = scalar_lea.hbm %s5016_s7, 16384  ;;  %p4761_p6 = pneg %p5020_p10 }
  0x50   : > { %p4760_p7 = scmp.ne.s32.totalorder %s5016_s7, %s4759_s15  ;;  %s4764_s27 = scalar_lea.hbm %s6022_s0, 65536 }
  0x51   : > { %p4765_p11 = scmp.lt.s32.totalorder %s5016_s7, %s6022_s0  ;;  %p4766_p13 = scmp.lt.s32.totalorder %s4764_s27, %s4759_s15 }
  0x52   : > { %p4762_p9 = pnand %p4761_p6, %p4760_p7 }
  0x53   : > { %p4767_p0 = por %p4766_p13, %p4765_p11 }
  0x54   : > { %p4763_p12 = pneg %p4762_p9 }
  0x56   : > { %p4768_p3 = pnand %p4767_p0, %p4763_p12 }
  0x58   : > { %4771 = shalt.err (!%p4768_p3)
}
  0x59   : > { %s4772_s29 = scalar_lea.vmem %s5018_s8, 16384  ;;  %s4869_s9 = smov [#allocation2]  }
  0x5a   : > { %p4773_p5 = scmp.ne.s32.totalorder %s5018_s8, %s4772_s29  ;;  %s4777_s10 = sshll.u32 %s4869_s9, 4  ;;  %s4778_s10 = int_to_ptr.vmem [resolvable:$false] %s4777_s10 }
  0x5b   : > { %s4779_s16 = scalar_lea.vmem %s4778_s10, 32768  ;;  %p4780_p9 = scmp.lt.s32.totalorder %s5018_s8, %s4778_s10 }
  0x5c   : > { %p4775_p2 = pnand %p4773_p5, %p4761_p6  ;;  %p4781_p1 = scmp.lt.s32.totalorder %s4779_s16, %s4772_s29 }
  0x5e   : > { %p4776_p7 = pneg %p4775_p2  ;;  %p4782_p4 = por %p4781_p1, %p4780_p9 }
  0x60   : > { %p4783_p8 = pnand %p4782_p4, %p4776_p7 }
  0x62   : > { %4786 = shalt.err (!%p4783_p8)
}
  0x63   : > { %s6040_s15 = smov 64   ;;  %p6041_p6 = scmp.ne.s32.totalorder %s6035_s26, 0 }
  0x64   : > { %4456 = dma.hbm_to_vmem [thread:$0]  (!%p5020_p10), %s5016_s7, 16384, %s5018_s8, %s5024_s13, %s6040_s15, %s6040_s15, %s4865_s11  }
  0x65   : > { %248 = sbr.rel (%p6041_p6) target bundleno = 1405 (0x57d), region = 40 }
  0x6a   : > { %s5051_s28 = sand.u32 1, %s4851_s19   ;;  %p6042_p4 = scmp.ne.s32.totalorder %s6033_s24, 0 }
  0x6b   : > { %s3516_s10 = sshll.u32 %s5051_s28, 10  ;;  %s251_s27 = scalar_lea.sflag [#allocation3], %s5051_s28 }
  0x6c   : > { %s5055_s30 = scalar_lea.vmem [#allocation2], %s3516_s10 }
  0x6d   : > { %4830 = dma.done.wait (%p6042_p4), %s251_s27, 16384  }
  0x6e   : > { %4832 = vsyncadd (%p6042_p4), %s251_s27, 4294950912  ;;  %p6043_p8 = scmp.eq.s32.totalorder %s4924_s22, 0 }
  0x70   : > { %4834 = dma.done.wait (%p6043_p8), [#allocation6], 1040   ;;  %p6044_p1 = pmov %p6043_p8 }
  0x72   : > { %4836 = vsyncadd (%p6044_p1), [#allocation6], 4294966256  ;;  %p6045_p10 = pmov %p6044_p1 }
  0x73   : > { %p6046_p12 = pmov %p6044_p1 }
  0x74   : > { %4838 = dma.done.wait (%p6045_p10), [#allocation9], 4096  }
  0x75   : > { %4840 = vsyncadd (%p6046_p12), [#allocation9], 4294963200  ;;  %v4513_v0 = vld [vmem:[#allocation5 + $0x38] sm:$0xff]   ;;  %v4514_v1 = vld [vmem:[#allocation5 + $0x30] sm:$0xff]   ;;  %vm4871_vm0 = vmmov 0   ;;  %s3521_s24 = sshll.u32 %s5051_s28, 3 }
  0x76   : > { %4097 = vmatprep.subr.bf16.mxu0 %v4513_v0  ;;  %4404 = vmatprep.subr.bf16.mxu1 %v4513_v0  ;;  %v4515_v2 = vld [vmem:[#allocation5 + $0x28] sm:$0xff]   ;;  %v4516_v3 = vld [vmem:[#allocation5 + $0x20] sm:$0xff]   ;;  %v4517_v5 = vld [vmem:[#allocation5 + $0x18] sm:$0xff]   ;;  %s296_s26 = scalar_lea.vmem [#allocation11], %s3521_s24  ;;  %s3660_s7 = sshll.u32 %s4924_s22, 7 }
  0x77   : > { %4098 = vmatpush3.bf16.msra.mxu0 %v4513_v0  ;;  %4412 = vmatpush3.bf16.msra.mxu1 %v4513_v0  ;;  %v4521_v4 = vld [vmem:[%s5055_s30] sm:$0xff]   ;;  %v4518_v6 = vld [vmem:[#allocation5 + $0x10] sm:$0xff]   ;;  %v4519_v7 = vld [vmem:[#allocation5 + $0x8] sm:$0xff]   ;;  %s3397_s11 = sshll.u32 %s296_s26, 4  ;;  %s5982_s13 = scalar_lea.hbm %s6027_s5, %s3660_s7  ;;  %s5977_s11 = int_to_ptr.vmem [resolvable:$true] %s3397_s11 }
  0x78   : > { %4099 = vmatprep.subr.bf16.mxu0 %v4514_v1  ;;  %4405 = vmatprep.subr.bf16.mxu1 %v4514_v1  ;;  %v4520_v8 = vld [vmem:[#allocation5] sm:$0xff]   ;;  %v4522_v9 = vld [vmem:[%s5055_s30 + $0x8] sm:$0xff]   ;;  %v4523_v10 = vld [vmem:[%s5055_s30 + $0x10] sm:$0xff]   ;;  %s3384_s6 = scalar_lea.sflag [#allocation4], %s5051_s28  ;;  %s4787_s29 = scalar_lea.vmem %s5977_s11, 128 }
  0x79   : > { %4113 = vmatprep.mubr.bf16.mxu0 %v4521_v4  ;;  %v4524_v11 = vld [vmem:[%s5055_s30 + $0x18] sm:$0xff]   ;;  %v4525_v12 = vld [vmem:[%s5055_s30 + $0x20] sm:$0xff]   ;;  %v4526_v13 = vld [vmem:[%s5055_s30 + $0x28] sm:$0xff]   ;;  %p4788_p11 = scmp.ne.s32.totalorder %s5977_s11, %s4787_s29  ;;  %p6095_p13 = scmp.ne.s32.totalorder %s6038_s23, 0 }
  0x7a   : > { %v4527_v14 = vld [vmem:[%s5055_s30 + $0x30] sm:$0xff]   ;;  %v4528_v15 = vld [vmem:[%s5055_s30 + $0x38] sm:$0xff]   ;;  %v4529_v16 = vld [vmem:[%s5055_s30 + $0x40] sm:$0xff]   ;;  %s4872_s22 = smov [#allocation11]  }
  0x7b   : > { %4100 = vmatpush3.bf16.msra.mxu0 %v4514_v1  ;;  %4413 = vmatpush3.bf16.msra.mxu1 %v4514_v1  ;;  %v4530_v17 = vld [vmem:[%s5055_s30 + $0x48] sm:$0xff]   ;;  %v4531_v18 = vld [vmem:[%s5055_s30 + $0x50] sm:$0xff]   ;;  %v4532_v19 = vld [vmem:[%s5055_s30 + $0x58] sm:$0xff]   ;;  %p4789_p0 = pnand %p4788_p11, %p6095_p13  ;;  %s4791_s9 = sshll.u32 %s4872_s22, 4  ;;  %s4792_s9 = int_to_ptr.vmem [resolvable:$false] %s4791_s9 }
  0x7c   : > { %4101 = vmatprep.subr.bf16.mxu0 %v4515_v2  ;;  %4406 = vmatprep.subr.bf16.mxu1 %v4515_v2  ;;  %v4533_v20 = vld [vmem:[%s5055_s30 + $0x60] sm:$0xff]   ;;  %v4534_v21 = vld [vmem:[%s5055_s30 + $0x68] sm:$0xff]   ;;  %v4535_v22 = vld [vmem:[%s5055_s30 + $0x70] sm:$0xff]   ;;  %s4793_s16 = scalar_lea.vmem %s4792_s9, 256  ;;  %p4794_p5 = scmp.lt.s32.totalorder %s5977_s11, %s4792_s9 }
  0x7d   : > { %v4536_v23 = vld [vmem:[%s5055_s30 + $0x78] sm:$0xff]   ;;  %v4537_v24 = vld [vmem:[%s5055_s30 + $0x80] sm:$0xff]   ;;  %v4538_v25 = vld [vmem:[%s5055_s30 + $0x88] sm:$0xff]   ;;  %p4790_p3 = pneg %p4789_p0  ;;  %p4795_p2 = scmp.lt.s32.totalorder %s4793_s16, %s4787_s29 }
  0x7e   : > { %v4539_v26 = vld [vmem:[%s5055_s30 + $0x90] sm:$0xff]   ;;  %v4540_v27 = vld [vmem:[%s5055_s30 + $0x98] sm:$0xff]   ;;  %v4541_v28 = vld [vmem:[%s5055_s30 + $0xa0] sm:$0xff]  }
  0x7f   : > { %4102 = vmatpush3.bf16.msra.mxu0 %v4515_v2  ;;  %4414 = vmatpush3.bf16.msra.mxu1 %v4515_v2  ;;  %v4573_v29 = vld [vmem:[%s5055_s30 + $0x310] sm:$0xff]   ;;  %v4574_v30 = vld [vmem:[%s5055_s30 + $0x318] sm:$0xff]   ;;  %v4542_v31 = vld [vmem:[%s5055_s30 + $0xa8] sm:$0xff]   ;;  %p4796_p7 = por %p4795_p2, %p4794_p5 }
  0x80   : > { %4103 = vmatprep.subr.bf16.mxu0 %v4516_v3  ;;  %4407 = vmatprep.subr.bf16.mxu1 %v4516_v3  ;;  %v4543_v32 = vld [vmem:[%s5055_s30 + $0xb0] sm:$0xff]   ;;  %v4577_v33 = vld [vmem:[%s5055_s30 + $0x320] sm:$0xff]   ;;  %v4578_v34 = vld [vmem:[%s5055_s30 + $0x328] sm:$0xff]  }
  0x81   : > { %4309 = vmatprep.mubr.bf16.mxu1 %v4573_v29  ;;  %v4544_v35 = vld [vmem:[%s5055_s30 + $0xb8] sm:$0xff]   ;;  %v4545_v36 = vld [vmem:[%s5055_s30 + $0xc0] sm:$0xff]   ;;  %v4581_v37 = vld [vmem:[%s5055_s30 + $0x330] sm:$0xff]   ;;  %p4797_p9 = pnand %p4796_p7, %p4790_p3 }
  0x82   : > { %v4582_v38 = vld [vmem:[%s5055_s30 + $0x338] sm:$0xff]   ;;  %v4546_v39 = vld [vmem:[%s5055_s30 + $0xc8] sm:$0xff]   ;;  %v4547_v40 = vld [vmem:[%s5055_s30 + $0xd0] sm:$0xff]  }
  0x83   : > { %4104 = vmatpush3.bf16.msra.mxu0 %v4516_v3  ;;  %4415 = vmatpush3.bf16.msra.mxu1 %v4516_v3  ;;  %v4585_v41 = vld [vmem:[%s5055_s30 + $0x340] sm:$0xff]   ;;  %v4586_v42 = vld [vmem:[%s5055_s30 + $0x348] sm:$0xff]   ;;  %v4548_v43 = vld [vmem:[%s5055_s30 + $0xd8] sm:$0xff]  }
  0x84   : > { %4105 = vmatprep.subr.bf16.mxu0 %v4517_v5  ;;  %4408 = vmatprep.subr.bf16.mxu1 %v4517_v5  ;;  %v4549_v44 = vld [vmem:[%s5055_s30 + $0xe0] sm:$0xff]   ;;  %v4589_v45 = vld [vmem:[%s5055_s30 + $0x350] sm:$0xff]   ;;  %v4590_v46 = vld [vmem:[%s5055_s30 + $0x358] sm:$0xff]  }
  0x85   : > { %v4550_v47 = vld [vmem:[%s5055_s30 + $0xe8] sm:$0xff]   ;;  %v4551_v48 = vld [vmem:[%s5055_s30 + $0xf0] sm:$0xff]   ;;  %v4593_v49 = vld [vmem:[%s5055_s30 + $0x360] sm:$0xff]  }
  0x86   : > { %v4594_v50 = vld [vmem:[%s5055_s30 + $0x368] sm:$0xff]   ;;  %v4552_v51 = vld [vmem:[%s5055_s30 + $0xf8] sm:$0xff]   ;;  %v4553_v52 = vld [vmem:[%s5055_s30 + $0x100] sm:$0xff]  }
  0x87   : > { %4106 = vmatpush3.bf16.msra.mxu0 %v4517_v5  ;;  %4416 = vmatpush3.bf16.msra.mxu1 %v4517_v5  ;;  %v4597_v53 = vld [vmem:[%s5055_s30 + $0x370] sm:$0xff]   ;;  %v4598_v54 = vld [vmem:[%s5055_s30 + $0x378] sm:$0xff]   ;;  %v4554_v55 = vld [vmem:[%s5055_s30 + $0x108] sm:$0xff]  }
  0x88   : > { %4107 = vmatprep.subr.bf16.mxu0 %v4518_v6  ;;  %4409 = vmatprep.subr.bf16.mxu1 %v4518_v6  ;;  %v4555_v56 = vld [vmem:[%s5055_s30 + $0x110] sm:$0xff]   ;;  %v4601_v57 = vld [vmem:[%s5055_s30 + $0x380] sm:$0xff]   ;;  %v4602_v58 = vld [vmem:[%s5055_s30 + $0x388] sm:$0xff]  }
  0x89   : > { %v4556_v59 = vld [vmem:[%s5055_s30 + $0x118] sm:$0xff]   ;;  %v4557_v60 = vld [vmem:[%s5055_s30 + $0x120] sm:$0xff]   ;;  %v4605_v61 = vld [vmem:[%s5055_s30 + $0x390] sm:$0xff]  }
  0x8a   : > { %v4606_v62 = vld [vmem:[%s5055_s30 + $0x398] sm:$0xff]   ;;  %v4558_v63 = vld [vmem:[%s5055_s30 + $0x128] sm:$0xff]   ;;  %v4559_v0 = vld [vmem:[%s5055_s30 + $0x130] sm:$0xff]  }
  0x8b   : > { %4108 = vmatpush3.bf16.msra.mxu0 %v4518_v6  ;;  %4417 = vmatpush3.bf16.msra.mxu1 %v4518_v6  ;;  %v4609_v1 = vld [vmem:[%s5055_s30 + $0x3a0] sm:$0xff]   ;;  %v4610_v2 = vld [vmem:[%s5055_s30 + $0x3a8] sm:$0xff]   ;;  %v4560_v3 = vld [vmem:[%s5055_s30 + $0x138] sm:$0xff]  }
  0x8c   : > { %4109 = vmatprep.subr.bf16.mxu0 %v4519_v7  ;;  %4410 = vmatprep.subr.bf16.mxu1 %v4519_v7  ;;  %v4561_v4 = vld [vmem:[%s5055_s30 + $0x140] sm:$0xff]   ;;  %v4613_v5 = vld [vmem:[%s5055_s30 + $0x3b0] sm:$0xff]   ;;  %v4614_v6 = vld [vmem:[%s5055_s30 + $0x3b8] sm:$0xff]  }
  0x8d   : > { %v4572_v29 = vld [vmem:[%s5055_s30 + $0x198] sm:$0xff]  }
  0x8f   : > { %4110 = vmatpush3.bf16.msra.mxu0 %v4519_v7  ;;  %4418 = vmatpush3.bf16.msra.mxu1 %v4519_v7  ;;  %v4562_v7 = vld [vmem:[%s5055_s30 + $0x148] sm:$0xff]  }
  0x90   : > { %4111 = vmatprep.subr.bf16.mxu0 %v4520_v8  ;;  %4411 = vmatprep.subr.bf16.mxu1 %v4520_v8 }
  0x93   : > { %4112 = vmatpush3.bf16.msra.mxu0 %v4520_v8  ;;  %4419 = vmatpush3.bf16.msra.mxu1 %v4520_v8  ;;  %v4563_v8 = vld [vmem:[%s5055_s30 + $0x150] sm:$0xff]  }
  0x96   : > { %4114 = vmatmul.mubr.bf16.vlgmr.msra.gmra.mxu0 %v4522_v9  ;;  %4310 = vmatmul.mubr.bf16.vlgmr.msra.gmra.mxu1 %v4574_v30  ;;  %v4617_v9 = vld [vmem:[%s5055_s30 + $0x3c0] sm:$0xff]  }
  0x97   : > { %4117 = vmatprep.mubr.bf16.mxu0 %v4523_v10  ;;  %4313 = vmatprep.mubr.bf16.mxu1 %v4577_v33  ;;  %v4618_v10 = vld [vmem:[%s5055_s30 + $0x3c8] sm:$0xff]   ;;  %v4575_v30 = vld [vmem:[%s5055_s30 + $0x1a0] sm:$0xff]  }
  0x9e   : > { %4118 = vmatmul.mubr.bf16.gmra.mxu0 %v4524_v11  ;;  %4314 = vmatmul.mubr.bf16.gmra.mxu1 %v4578_v34  ;;  %v4564_v11 = vld [vmem:[%s5055_s30 + $0x158] sm:$0xff]  }
  0x9f   : > { %4121 = vmatprep.mubr.bf16.mxu0 %v4525_v12  ;;  %4317 = vmatprep.mubr.bf16.mxu1 %v4581_v37  ;;  %v4565_v12 = vld [vmem:[%s5055_s30 + $0x160] sm:$0xff]  }
  0xa6   : > { %4122 = vmatmul.mubr.bf16.gmra.mxu0 %v4526_v13  ;;  %4318 = vmatmul.mubr.bf16.gmra.mxu1 %v4582_v38  ;;  %v4621_v13 = vld [vmem:[%s5055_s30 + $0x3d0] sm:$0xff]  }
  0xa7   : > { %4125 = vmatprep.mubr.bf16.mxu0 %v4527_v14  ;;  %4321 = vmatprep.mubr.bf16.mxu1 %v4585_v41  ;;  %v4622_v14 = vld [vmem:[%s5055_s30 + $0x3d8] sm:$0xff]  }
  0xa8   : > { %v4580_v41 = vld [vmem:[%s5055_s30 + $0x1b8] sm:$0xff]  }
  0xae   : > { %4126 = vmatmul.mubr.bf16.gmra.mxu0 %v4528_v15  ;;  %4322 = vmatmul.mubr.bf16.gmra.mxu1 %v4586_v42  ;;  %v4566_v15 = vld [vmem:[%s5055_s30 + $0x168] sm:$0xff]   ;;  %v4583_v42 = vld [vmem:[%s5055_s30 + $0x1c0] sm:$0xff]  }
  0xaf   : > { %4129 = vmatprep.mubr.bf16.mxu0 %v4529_v16  ;;  %4325 = vmatprep.mubr.bf16.mxu1 %v4589_v45  ;;  %v4567_v16 = vld [vmem:[%s5055_s30 + $0x170] sm:$0xff]  }
  0xb6   : > { %4130 = vmatmul.mubr.bf16.gmra.mxu0 %v4530_v17  ;;  %4326 = vmatmul.mubr.bf16.gmra.mxu1 %v4590_v46  ;;  %v4625_v17 = vld [vmem:[%s5055_s30 + $0x3e0] sm:$0xff]  }
  0xb7   : > { %4133 = vmatprep.mubr.bf16.mxu0 %v4531_v18  ;;  %4329 = vmatprep.mubr.bf16.mxu1 %v4593_v49  ;;  %v4626_v18 = vld [vmem:[%s5055_s30 + $0x3e8] sm:$0xff]  }
  0xbe   : > { %4134 = vmatmul.mubr.bf16.gmra.mxu0 %v4532_v19  ;;  %4330 = vmatmul.mubr.bf16.gmra.mxu1 %v4594_v50  ;;  %v4568_v19 = vld [vmem:[%s5055_s30 + $0x178] sm:$0xff]  }
  0xbf   : > { %4137 = vmatprep.mubr.bf16.mxu0 %v4533_v20  ;;  %4333 = vmatprep.mubr.bf16.mxu1 %v4597_v53  ;;  %v4569_v20 = vld [vmem:[%s5055_s30 + $0x180] sm:$0xff]   ;;  %v4588_v53 = vld [vmem:[%s5055_s30 + $0x1d8] sm:$0xff]  }
  0xc6   : > { %4138 = vmatmul.mubr.bf16.gmra.mxu0 %v4534_v21  ;;  %4334 = vmatmul.mubr.bf16.gmra.mxu1 %v4598_v54  ;;  %v4629_v21 = vld [vmem:[%s5055_s30 + $0x3f0] sm:$0xff]   ;;  %v4591_v54 = vld [vmem:[%s5055_s30 + $0x1e0] sm:$0xff]  }
  0xc7   : > { %4141 = vmatprep.mubr.bf16.mxu0 %v4535_v22  ;;  %4337 = vmatprep.mubr.bf16.mxu1 %v4601_v57  ;;  %v4630_v22 = vld [vmem:[%s5055_s30 + $0x3f8] sm:$0xff]  }
  0xce   : > { %4142 = vmatmul.mubr.bf16.gmra.mxu0 %v4536_v23  ;;  %4338 = vmatmul.mubr.bf16.gmra.mxu1 %v4602_v58  ;;  %v4570_v23 = vld [vmem:[%s5055_s30 + $0x188] sm:$0xff]  }
  0xcf   : > { %4145 = vmatprep.mubr.bf16.mxu0 %v4537_v24  ;;  %4341 = vmatprep.mubr.bf16.mxu1 %v4605_v61  ;;  %v4571_v24 = vld [vmem:[%s5055_s30 + $0x190] sm:$0xff]  }
  0xd6   : > { %4146 = vmatmul.mubr.bf16.gmra.mxu0 %v4538_v25  ;;  %4342 = vmatmul.mubr.bf16.gmra.mxu1 %v4606_v62 }
  0xd7   : > { %4149 = vmatprep.mubr.bf16.mxu0 %v4539_v26  ;;  %4345 = vmatprep.mubr.bf16.mxu1 %v4609_v1  ;;  %v2708_v26 = vld [vmem:[#allocation8 + $0x8] sm:$0xff]  ;;  %v4596_v1 = vld [vmem:[%s5055_s30 + $0x1f8] sm:$0xff]  }
  0xde   : > { %4150 = vmatmul.mubr.bf16.gmra.mxu0 %v4540_v27  ;;  %4346 = vmatmul.mubr.bf16.gmra.mxu1 %v4610_v2  ;;  %v4599_v2 = vld [vmem:[%s5055_s30 + $0x200] sm:$0xff]  }
  0xdf   : > { %4153 = vmatprep.mubr.bf16.mxu0 %v4541_v28  ;;  %4349 = vmatprep.mubr.bf16.mxu1 %v4613_v5 }
  0xe6   : > { %4154 = vmatmul.mubr.bf16.gmra.mxu0 %v4542_v31  ;;  %4350 = vmatmul.mubr.bf16.gmra.mxu1 %v4614_v6  ;;  %v5204_v6 = vld [vmem:[#allocation7] ss:$0 sm:$0xff] }
  0xe7   : > { %4157 = vmatprep.mubr.bf16.mxu0 %v4543_v32  ;;  %4353 = vmatprep.mubr.bf16.mxu1 %v4617_v9  ;;  %v4600_v9 = vld [vmem:[%s5055_s30 + $0x208] sm:$0xff]  }
  0xee   : > { %4158 = vmatmul.mubr.bf16.gmra.mxu0 %v4544_v35  ;;  %4354 = vmatmul.mubr.bf16.gmra.mxu1 %v4618_v10  ;;  %v4576_v35 = vld [vmem:[%s5055_s30 + $0x1a8] sm:$0xff]  }
  0xef   : > { %4161 = vmatprep.mubr.bf16.mxu0 %v4545_v36  ;;  %4357 = vmatprep.mubr.bf16.mxu1 %v4621_v13  ;;  %v4579_v36 = vld [vmem:[%s5055_s30 + $0x1b0] sm:$0xff]  }
  0xf6   : > { %4162 = vmatmul.mubr.bf16.gmra.mxu0 %v4546_v39  ;;  %4358 = vmatmul.mubr.bf16.gmra.mxu1 %v4622_v14 }
  0xf7   : > { %4165 = vmatprep.mubr.bf16.mxu0 %v4547_v40  ;;  %4361 = vmatprep.mubr.bf16.mxu1 %v4625_v17 }
  0xfe   : > { %4166 = vmatmul.mubr.bf16.gmra.mxu0 %v4548_v43  ;;  %4362 = vmatmul.mubr.bf16.gmra.mxu1 %v4626_v18 }
  0xff   : > { %4169 = vmatprep.mubr.bf16.mxu0 %v4549_v44  ;;  %4365 = vmatprep.mubr.bf16.mxu1 %v4629_v21 }
 0x106   : > { %4170 = vmatmul.mubr.bf16.gmra.mxu0 %v4550_v47  ;;  %4366 = vmatmul.mubr.bf16.gmra.mxu1 %v4630_v22  ;;  %v4584_v47 = vld [vmem:[%s5055_s30 + $0x1c8] sm:$0xff]  }
 0x107   : > { %4173 = vmatprep.mubr.bf16.mxu0 %v4551_v48  ;;  %2787 = vmatprep.mubr.f32.mxu1 %v2708_v26  ;;  %v4587_v48 = vld [vmem:[%s5055_s30 + $0x1d0] sm:$0xff]  }
 0x10e   : > { %4174 = vmatmul.mubr.bf16.gmra.mxu0 %v4552_v51 }
 0x10f   : > { %4177 = vmatprep.mubr.bf16.mxu0 %v4553_v52 }
 0x116   : > { %4178 = vmatmul.mubr.bf16.gmra.mxu0 %v4554_v55 }
 0x117   : > { %4181 = vmatprep.mubr.bf16.mxu0 %v4555_v56 }
 0x11e   : > { %4182 = vmatmul.mubr.bf16.gmra.mxu0 %v4556_v59  ;;  %v4592_v59 = vld [vmem:[%s5055_s30 + $0x1e8] sm:$0xff]  }
 0x11f   : > { %4185 = vmatprep.mubr.bf16.mxu0 %v4557_v60  ;;  %v4595_v60 = vld [vmem:[%s5055_s30 + $0x1f0] sm:$0xff]  }
 0x126   : > { %4186 = vmatmul.mubr.bf16.gmra.mxu0 %v4558_v63 }
 0x127   : > { %4189 = vmatprep.mubr.bf16.mxu0 %v4559_v0 }
 0x12e   : > { %4190 = vmatmul.mubr.bf16.gmra.mxu0 %v4560_v3 }
 0x12f   : > { %4193 = vmatprep.mubr.bf16.mxu0 %v4561_v4 }
 0x136   : > { %4194 = vmatmul.mubr.bf16.gmra.mxu0 %v4562_v7 }
 0x137   : > { %4197 = vmatprep.mubr.bf16.mxu0 %v4563_v8 }
 0x13e   : > { %4198 = vmatmul.mubr.bf16.gmra.mxu0 %v4564_v11 }
 0x13f   : > { %4201 = vmatprep.mubr.bf16.mxu0 %v4565_v12  ;;  %v4603_v12 = vld [vmem:[%s5055_s30 + $0x210] sm:$0xff]  }
 0x146   : > { %4202 = vmatmul.mubr.bf16.gmra.mxu0 %v4566_v15 }
 0x147   : > { %4205 = vmatprep.mubr.bf16.mxu0 %v4567_v16 }
 0x14e   : > { %4206 = vmatmul.mubr.bf16.gmra.mxu0 %v4568_v19 }
 0x14f   : > { %4209 = vmatprep.mubr.bf16.mxu0 %v4569_v20 }
 0x156   : > { %v5150_v25 = vpop.f32.mrf.mxu0  ;;  %4210 = vmatmul.mubr.bf16.gmra.mxu0 %v4570_v23 }
 0x157   : > { %4213 = vmatprep.mubr.bf16.mxu0 %v4571_v24 }
 0x158   : > { %v5152_v27 = vpop.f32.mrf.mxu0 }
 0x15a   : > { %v5154_v28 = vpop.f32.mrf.mxu0 }
 0x15c   : > { %v5158_v31 = vpop.f32.mrf.mxu0 }
 0x15e   : > { %v5160_v32 = vpop.f32.mrf.mxu0  ;;  %4214 = vmatmul.mubr.bf16.gmra.mxu0 %v4572_v29 }
 0x15f   : > { %4217 = vmatprep.mubr.bf16.mxu0 %v4575_v30 }
 0x160   : > { %v5162_v33 = vpop.f32.mrf.mxu0 }
 0x162   : > { %v5164_v34 = vpop.f32.mrf.mxu0 }
 0x164   : > { %v5168_v37 = vpop.f32.mrf.mxu0 }
 0x166   : > { %v5170_v38 = vpop.f32.mrf.mxu0  ;;  %4218 = vmatmul.mubr.bf16.gmra.mxu0 %v4576_v35 }
 0x167   : > { %4221 = vmatprep.mubr.bf16.mxu0 %v4579_v36 }
 0x168   : > { %v5172_v39 = vpop.f32.mrf.mxu0 }
 0x16a   : > { %v5174_v40 = vpop.f32.mrf.mxu0 }
 0x16b   : > { %v1472_v30 = vadd.f32 %v5174_v40, %v5204_v6 }
 0x16c   : > { %v5178_v43 = vpop.f32.mrf.mxu0 }
 0x16e   : > { %v4127_v44 = vpop.f32.mrf.mxu0  ;;  %4222 = vmatmul.mubr.bf16.gmra.mxu0 %v4580_v41  ;;  %v4604_v41 = vld [vmem:[%s5055_s30 + $0x218] sm:$0xff]  }
 0x16f   : > { %4225 = vmatprep.mubr.bf16.mxu0 %v4583_v42  ;;  %v1485_v13 = vadd.f32 %v4127_v44, %v5204_v6 }
 0x170   : > { %v1476_v45 = vpop.f32.mrf.mxu0 }
 0x171   : > { %v2465_v22 = vmax.f32 %v1485_v13, 0.0  ;;  %v1477_v23 = vadd.f32 %v5204_v6, %v1476_v45  ;;  %v4607_v45 = vld [vmem:[%s5055_s30 + $0x220] sm:$0xff]   ;;  %v1448_v13 = vadd.f32 %v5204_v6, %v5168_v37 }
 0x172   : > { %v4128_v46 = vpop.f32.mrf.mxu0 }
 0x173   : > { %v1488_v7 = vadd.f32 %v4128_v46, %v5204_v6  ;;  %v1469_v46 = vadd.f32 %v5170_v38, %v5204_v6 }
 0x174   : > { %v1479_v49 = vpop.f32.mrf.mxu0 }
 0x175   : > { %v2466_v17 = vmax.f32 %v1488_v7, 0.0  ;;  %v1480_v18 = vadd.f32 %v5204_v6, %v1479_v49 }
 0x176   : > { %v5182_v50 = vpop.f32.mrf.mxu0  ;;  %4226 = vmatmul.mubr.bf16.gmra.mxu0 %v4584_v47  ;;  %v2463_v47 = vmax.f32 %v1477_v23, 0.0  ;;  %v4615_v23 = vld [vmem:[%s5055_s30 + $0x240] sm:$0xff]  }
 0x177   : > { %4229 = vmatprep.mubr.bf16.mxu0 %v4587_v48  ;;  %v2464_v35 = vmax.f32 %v1480_v18, 0.0  ;;  %v1440_v18 = vadd.f32 %v5154_v28, %v5204_v6 }
 0x178   : > { %v5184_v51 = vpop.f32.mrf.mxu0 }
 0x17a   : > { %v5186_v52 = vpop.f32.mrf.mxu0 }
 0x17b   : > { %v1504_v37 = vadd.f32 %v5186_v52, %v5204_v6 }
 0x17c   : > { %v5190_v55 = vpop.f32.mrf.mxu0 }
 0x17d   : > { %v1496_v28 = vadd.f32 %v5204_v6, %v5190_v55  ;;  %v1429_v55 = vadd.f32 %v5204_v6, %v5152_v27  ;;  %v2710_v27 = vld [vmem:[#allocation8 + $0x18] sm:$0xff] }
 0x17e   : > { %v5192_v56 = vpop.f32.mrf.mxu0  ;;  %4230 = vmatmul.mubr.bf16.gmra.mxu0 %v4588_v53  ;;  %v2462_v53 = vmax.f32 %v1472_v30, 0.0  ;;  %v2470_v30 = vmax.f32 %v1504_v37, 0.0 }
 0x17f   : > { %4233 = vmatprep.mubr.bf16.mxu0 %v4591_v54  ;;  %v1464_v54 = vadd.f32 %v5204_v6, %v5178_v43  ;;  %v1517_v7 = vadd.f32 %v5192_v56, %v5204_v6 }
 0x180   : > { %v5194_v57 = vpop.f32.mrf.mxu0 }
 0x182   : > { %v5196_v58 = vpop.f32.mrf.mxu0 }
 0x183   : > { %v1520_v43 = vadd.f32 %v5196_v58, %v5204_v6 }
 0x184   : > { %v5200_v61 = vpop.f32.mrf.mxu0 }
 0x186   : > { %v4139_v62 = vpop.f32.mrf.mxu0  ;;  %4234 = vmatmul.mubr.bf16.gmra.mxu0 %v4592_v59 }
 0x187   : > { %4237 = vmatprep.mubr.bf16.mxu0 %v4595_v60  ;;  %v1533_v42 = vadd.f32 %v4139_v62, %v5204_v6  ;;  %v2461_v62 = vmax.f32 %v1469_v46, 0.0 }
 0x188   : > { %v1524_v63 = vpop.f32.mrf.mxu0 }
 0x189   : > { %v2477_v60 = vmax.f32 %v1533_v42, 0.0  ;;  %v1525_v38 = vadd.f32 %v5204_v6, %v1524_v63 }
 0x18a   : > { %v4140_v0 = vpop.f32.mrf.mxu0 }
 0x18b   : > { %v1536_v26 = vadd.f32 %v4140_v0, %v5204_v6  ;;  %v1461_v0 = vadd.f32 %v5204_v6, %v5172_v39  ;;  %v2475_v39 = vmax.f32 %v1525_v38, 0.0 }
 0x18c   : > { %v1527_v3 = vpop.f32.mrf.mxu0 }
 0x18d   : > { %v2478_v49 = vmax.f32 %v1536_v26, 0.0  ;;  %v1528_v40 = vadd.f32 %v5204_v6, %v1527_v3  ;;  %v1456_v3 = vadd.f32 %v5164_v34, %v5204_v6  ;;  %v2459_v58 = vmax.f32 %v1461_v0, 0.0 }
 0x18e   : > { %v4143_v4 = vpop.f32.mrf.mxu0  ;;  %4238 = vmatmul.mubr.bf16.gmra.mxu0 %v4596_v1  ;;  %v1512_v34 = vadd.f32 %v5204_v6, %v5200_v61  ;;  %v1445_v61 = vadd.f32 %v5204_v6, %v5162_v33  ;;  %v1437_v26 = vadd.f32 %v5150_v25, %v5204_v6  ;;  %v1493_v25 = vadd.f32 %v5204_v6, %v5184_v51 }
 0x18f   : > { %4241 = vmatprep.mubr.bf16.mxu0 %v4599_v2  ;;  %v1549_v10 = vadd.f32 %v4143_v4, %v5204_v6  ;;  %v2476_v2 = vmax.f32 %v1528_v40, 0.0  ;;  %v2460_v4 = vmax.f32 %v1464_v54, 0.0  ;;  %v2451_v51 = vmax.f32 %v1429_v55, 0.0 }
 0x190   : > { %v1540_v5 = vpop.f32.mrf.mxu0  ;;  %v2455_v52 = vmax.f32 %v1445_v61, 0.0  ;;  %v2467_v40 = vmax.f32 %v1493_v25, 0.0 }
 0x191   : > { %v2481_v20 = vmax.f32 %v1549_v10, 0.0  ;;  %v1541_v21 = vadd.f32 %v5204_v6, %v1540_v5  ;;  %v4608_v5 = vld [vmem:[%s5055_s30 + $0x228] sm:$0xff]  }
 0x192   : > { %v4144_v8 = vpop.f32.mrf.mxu0 }
 0x193   : > { %v1552_v11 = vadd.f32 %v4144_v8, %v5204_v6  ;;  %v2479_v44 = vmax.f32 %v1541_v21, 0.0  ;;  %v4611_v8 = vld [vmem:[%s5055_s30 + $0x230] sm:$0xff]   ;;  %v4612_v21 = vld [vmem:[%s5055_s30 + $0x238] sm:$0xff]  }
 0x194   : > { %v1543_v14 = vpop.f32.mrf.mxu0 }
 0x195   : > { %v2482_v15 = vmax.f32 %v1552_v11, 0.0  ;;  %v1544_v16 = vadd.f32 %v5204_v6, %v1543_v14  ;;  %v2474_v11 = vmax.f32 %v1520_v43, 0.0  ;;  %v2473_v14 = vmax.f32 %v1517_v7, 0.0  ;;  %v4620_v43 = vld [vmem:[%s5055_s30 + $0x258] sm:$0xff]  }
 0x196   : > { %v5214_v19 = vpop.f32.mrf.mxu0  ;;  %4242 = vmatmul.mubr.bf16.gmra.mxu0 %v4600_v9  ;;  %v1453_v9 = vadd.f32 %v5160_v32, %v5204_v6  ;;  %v1509_v32 = vadd.f32 %v5204_v6, %v5194_v57 }
 0x197   : > { %3800 = vmatprep.subr.mxu1 %v2482_v15  ;;  %4245 = vmatprep.mubr.bf16.mxu0 %v4603_v12  ;;  %v2480_v29 = vmax.f32 %v1544_v16, 0.0  ;;  %v2458_v12 = vmax.f32 %v1456_v3, 0.0 }
 0x198   : > { %v5218_v24 = vpop.f32.mrf.mxu0  ;;  %3801 = vmatpush3.msra.mxu1 %v2466_v17  ;;  %v2457_v15 = vmax.f32 %v1453_v9, 0.0  ;;  %v2472_v17 = vmax.f32 %v1512_v34, 0.0  ;;  %v2471_v33 = vmax.f32 %v1509_v32, 0.0 }
 0x199   : > { %3802 = vmatprep.subr.mxu1 %v2481_v20  ;;  %v2456_v20 = vmax.f32 %v1448_v13, 0.0  ;;  %v4631_v13 = vld [vmem:[%s5055_s30 + $0x280] sm:$0xff]  }
 0x19a   : > { %v5223_v36 = vpop.f32.mrf.mxu0  ;;  %3803 = vmatpush3.msra.mxu1 %v2465_v22  ;;  %v1501_v22 = vadd.f32 %v5182_v50, %v5204_v6 }
 0x19b   : > { %3804 = vmatprep.subr.mxu1 %v2480_v29 }
 0x19c   : > { %v5230_v48 = vpop.f32.mrf.mxu0  ;;  %3805 = vmatpush3.msra.mxu1 %v2464_v35  ;;  %v2454_v35 = vmax.f32 %v1440_v18, 0.0  ;;  %v2469_v42 = vmax.f32 %v1501_v22, 0.0 }
 0x19d   : > { %3806 = vmatprep.subr.mxu1 %v2479_v44  ;;  %v2453_v44 = vmax.f32 %v1437_v26, 0.0 }
 0x19e   : > { %v5235_v59 = vpop.f32.mrf.mxu0  ;;  %4246 = vmatmul.mubr.bf16.gmra.mxu0 %v4604_v41  ;;  %3807 = vmatpush3.msra.mxu1 %v2463_v47  ;;  %v1432_v41 = vadd.f32 %v5204_v6, %v5158_v31  ;;  %v2468_v31 = vmax.f32 %v1496_v28, 0.0 }
 0x19f   : > { %3808 = vmatprep.subr.mxu1 %v2478_v49  ;;  %4249 = vmatprep.mubr.bf16.mxu0 %v4607_v45  ;;  %v4616_v49 = vld [vmem:[%s5055_s30 + $0x248] sm:$0xff]  }
 0x1a0   : > { %v5240_v1 = vpop.f32.mrf.mxu0  ;;  %3809 = vmatpush3.msra.mxu1 %v2462_v53  ;;  %v2452_v46 = vmax.f32 %v1432_v41, 0.0  ;;  %v4619_v53 = vld [vmem:[%s5055_s30 + $0x250] sm:$0xff]  }
 0x1a1   : > { %3810 = vmatprep.subr.mxu1 %v2477_v60  ;;  %v2707_v60 = vld [vmem:[#allocation8] sm:$0xff] }
 0x1a2   : > { %v5246_v63 = vpop.f32.mrf.mxu0  ;;  %3811 = vmatpush3.msra.mxu1 %v2461_v62 }
 0x1a3   : > { %3812 = vmatprep.subr.mxu1 %v2476_v2  ;;  %v4623_v2 = vld [vmem:[%s5055_s30 + $0x260] sm:$0xff]  }
 0x1a4   : > { %v5254_v10 = vpop.f32.mrf.mxu0  ;;  %3813 = vmatpush3.msra.mxu1 %v2460_v4 }
 0x1a5   : > { %3814 = vmatprep.subr.mxu1 %v2475_v39  ;;  %v4624_v39 = vld [vmem:[%s5055_s30 + $0x268] sm:$0xff]  }
 0x1a6   : > { %v5260_v56 = vpop.f32.mrf.mxu0  ;;  %4250 = vmatmul.mubr.bf16.gmra.mxu0 %v4608_v5  ;;  %3815 = vmatpush3.msra.mxu1 %v2459_v58 }
 0x1a7   : > { %3816 = vmatprep.subr.mxu1 %v2474_v11  ;;  %4253 = vmatprep.mubr.bf16.mxu0 %v4611_v8  ;;  %v4627_v8 = vld [vmem:[%s5055_s30 + $0x270] sm:$0xff]  }
 0x1a8   : > { %v5266_v16 = vpop.f32.mrf.mxu0  ;;  %3817 = vmatpush3.msra.mxu1 %v2458_v12  ;;  %v4628_v12 = vld [vmem:[%s5055_s30 + $0x278] sm:$0xff]  }
 0x1a9   : > { %3818 = vmatprep.subr.mxu1 %v2473_v14 }
 0x1aa   : > { %v5272_v57 = vpop.f32.mrf.mxu0  ;;  %3819 = vmatpush3.msra.mxu1 %v2457_v15 }
 0x1ab   : > { %3820 = vmatprep.subr.mxu1 %v2472_v17  ;;  %v4632_v17 = vld [vmem:[%s5055_s30 + $0x288] sm:$0xff]  }
 0x1ac   : > { %v5280_v29 = vpop.f32.mrf.mxu0  ;;  %3821 = vmatpush3.msra.mxu1 %v2456_v20 }
 0x1ad   : > { %3822 = vmatprep.subr.mxu1 %v2471_v33 }
 0x1ae   : > { %v5286_v50 = vpop.f32.mrf.mxu0  ;;  %4254 = vmatmul.mubr.bf16.gmra.mxu0 %v4612_v21  ;;  %3823 = vmatpush3.msra.mxu1 %v2455_v52  ;;  %v4633_v21 = vld [vmem:[%s5055_s30 + $0x290] sm:$0xff]  }
 0x1af   : > { %3824 = vmatprep.subr.mxu1 %v2470_v30  ;;  %4257 = vmatprep.mubr.bf16.mxu0 %v4615_v23  ;;  %v1613_v22 = vadd.f32 %v5286_v50, %v5204_v6 }
 0x1b0   : > { %v5292_v45 = vpop.f32.mrf.mxu0  ;;  %3825 = vmatpush3.msra.mxu1 %v2454_v35 }
 0x1b1   : > { %3826 = vmatprep.subr.mxu1 %v2469_v42  ;;  %v2497_v42 = vmax.f32 %v1613_v22, 0.0  ;;  %v1605_v50 = vadd.f32 %v5204_v6, %v5292_v45  ;;  %v4635_v45 = vld [vmem:[%s5055_s30 + $0x2a0] sm:$0xff]   ;;  %v1576_v22 = vadd.f32 %v5204_v6, %v5254_v10 }
 0x1b2   : > { %v4160_v47 = vpop.f32.mrf.mxu0  ;;  %3827 = vmatpush3.msra.mxu1 %v2453_v44 }
 0x1b3   : > { %3828 = vmatprep.subr.mxu1 %v2468_v31  ;;  %v1616_v61 = vadd.f32 %v4160_v47, %v5204_v6  ;;  %v1600_v31 = vadd.f32 %v5272_v57, %v5204_v6 }
 0x1b4   : > { %v1607_v54 = vpop.f32.mrf.mxu0  ;;  %3829 = vmatpush3.msra.mxu1 %v2452_v46 }
 0x1b5   : > { %3830 = vmatprep.subr.mxu1 %v2467_v40  ;;  %v2498_v52 = vmax.f32 %v1616_v61, 0.0  ;;  %v1608_v30 = vadd.f32 %v5204_v6, %v1607_v54  ;;  %v2495_v54 = vmax.f32 %v1605_v50, 0.0  ;;  %v4639_v50 = vld [vmem:[%s5055_s30 + $0x2c0] sm:$0xff]  }
 0x1b6   : > { %v5296_v38 = vpop.f32.mrf.mxu0  ;;  %4258 = vmatmul.mubr.bf16.gmra.mxu0 %v4616_v49  ;;  %3831 = vmatpush3.msra.mxu1 %v2451_v51  ;;  %v4634_v49 = vld [vmem:[%s5055_s30 + $0x298] sm:$0xff]   ;;  %v1597_v51 = vadd.f32 %v5260_v56, %v5204_v6 }
 0x1b7   : > { %4261 = vmatprep.mubr.bf16.mxu0 %v4619_v53  ;;  %2788 = vmatmul.mubr.f32.vlgmr.msra.gmra.mxu1 %v2707_v60  ;;  %v2496_v46 = vmax.f32 %v1608_v30, 0.0  ;;  %v1568_v30 = vadd.f32 %v5223_v36, %v5204_v6 }
 0x1b8   : > { %v5298_v62 = vpop.f32.mrf.mxu0  ;;  %2857 = vmatprep.mubr.f32.mxu1 %v2710_v27 }
 0x1ba   : > { %v5300_v0 = vpop.f32.mrf.mxu0 }
 0x1bb   : > { %v1632_v10 = vadd.f32 %v5300_v0, %v5204_v6 }
 0x1bc   : > { %v5304_v3 = vpop.f32.mrf.mxu0 }
 0x1bd   : > { %v1624_v36 = vadd.f32 %v5204_v6, %v5304_v3  ;;  %v1557_v3 = vadd.f32 %v5204_v6, %v5218_v24  ;;  %v2712_v24 = vld [vmem:[#allocation8 + $0x28] sm:$0xff] }
 0x1be   : > { %v5306_v4 = vpop.f32.mrf.mxu0  ;;  %4262 = vmatmul.mubr.bf16.gmra.mxu0 %v4620_v43  ;;  %v2494_v43 = vmax.f32 %v1600_v31, 0.0  ;;  %v2502_v31 = vmax.f32 %v1632_v10, 0.0 }
 0x1bf   : > { %4265 = vmatprep.mubr.bf16.mxu0 %v4623_v2  ;;  %v1592_v2 = vadd.f32 %v5204_v6, %v5280_v29  ;;  %v1645_v61 = vadd.f32 %v5306_v4, %v5204_v6 }
 0x1c0   : > { %v5308_v5 = vpop.f32.mrf.mxu0 }
 0x1c2   : > { %v5310_v7 = vpop.f32.mrf.mxu0 }
 0x1c3   : > { %v1648_v29 = vadd.f32 %v5310_v7, %v5204_v6 }
 0x1c4   : > { %v5314_v9 = vpop.f32.mrf.mxu0 }
 0x1c6   : > { %v4171_v58 = vpop.f32.mrf.mxu0  ;;  %4266 = vmatmul.mubr.bf16.gmra.mxu0 %v4624_v39 }
 0x1c7   : > { %4269 = vmatprep.mubr.bf16.mxu0 %v4627_v8  ;;  %v1661_v40 = vadd.f32 %v4171_v58, %v5204_v6  ;;  %v2493_v58 = vmax.f32 %v1597_v51, 0.0  ;;  %v2500_v51 = vmax.f32 %v1624_v36, 0.0 }
 0x1c8   : > { %v1652_v11 = vpop.f32.mrf.mxu0 }
 0x1c9   : > { %v2509_v8 = vmax.f32 %v1661_v40, 0.0  ;;  %v1653_v56 = vadd.f32 %v5204_v6, %v1652_v11 }
 0x1ca   : > { %v4172_v34 = vpop.f32.mrf.mxu0 }
 0x1cb   : > { %v1664_v44 = vadd.f32 %v4172_v34, %v5204_v6  ;;  %v1589_v34 = vadd.f32 %v5204_v6, %v5266_v16  ;;  %v2507_v16 = vmax.f32 %v1653_v56, 0.0 }
 0x1cc   : > { %v1655_v14 = vpop.f32.mrf.mxu0 }
 0x1cd   : > { %v2510_v27 = vmax.f32 %v1664_v44, 0.0  ;;  %v1656_v57 = vadd.f32 %v5204_v6, %v1655_v14  ;;  %v1584_v14 = vadd.f32 %v5246_v63, %v5204_v6  ;;  %v2491_v7 = vmax.f32 %v1589_v34, 0.0 }
 0x1ce   : > { %v4175_v32 = vpop.f32.mrf.mxu0  ;;  %4270 = vmatmul.mubr.bf16.gmra.mxu0 %v4628_v12  ;;  %v1640_v63 = vadd.f32 %v5204_v6, %v5314_v9  ;;  %v1573_v9 = vadd.f32 %v5204_v6, %v5240_v1  ;;  %v1565_v44 = vadd.f32 %v5214_v19, %v5204_v6  ;;  %v1621_v19 = vadd.f32 %v5204_v6, %v5298_v62 }
 0x1cf   : > { %4273 = vmatprep.mubr.bf16.mxu0 %v4631_v13  ;;  %v1677_v18 = vadd.f32 %v4175_v32, %v5204_v6  ;;  %v2508_v13 = vmax.f32 %v1656_v57, 0.0  ;;  %v2492_v32 = vmax.f32 %v1592_v2, 0.0  ;;  %v2483_v62 = vmax.f32 %v1557_v3, 0.0 }
 0x1d0   : > { %v1668_v15 = vpop.f32.mrf.mxu0  ;;  %v2487_v0 = vmax.f32 %v1573_v9, 0.0  ;;  %v2499_v57 = vmax.f32 %v1621_v19, 0.0 }
 0x1d1   : > { %v2513_v35 = vmax.f32 %v1677_v18, 0.0  ;;  %v1669_v41 = vadd.f32 %v5204_v6, %v1668_v15  ;;  %v4636_v15 = vld [vmem:[%s5055_s30 + $0x2a8] sm:$0xff]  }
 0x1d2   : > { %v4176_v37 = vpop.f32.mrf.mxu0 }
 0x1d3   : > { %v1680_v20 = vadd.f32 %v4176_v37, %v5204_v6  ;;  %v2511_v53 = vmax.f32 %v1669_v41, 0.0  ;;  %v4637_v37 = vld [vmem:[%s5055_s30 + $0x2b0] sm:$0xff]   ;;  %v4638_v41 = vld [vmem:[%s5055_s30 + $0x2b8] sm:$0xff]  }
 0x1d4   : > { %v1671_v33 = vpop.f32.mrf.mxu0 }
 0x1d5   : > { %v2514_v23 = vmax.f32 %v1680_v20, 0.0  ;;  %v1672_v26 = vadd.f32 %v5204_v6, %v1671_v33  ;;  %v2506_v20 = vmax.f32 %v1648_v29, 0.0  ;;  %v2505_v33 = vmax.f32 %v1645_v61, 0.0  ;;  %v4642_v29 = vld [vmem:[%s5055_s30 + $0x2d8] sm:$0xff]  }
 0x1d6   : > { %v5327_v28 = vpop.f32.mrf.mxu0  ;;  %4274 = vmatmul.mubr.bf16.gmra.mxu0 %v4632_v17  ;;  %v1581_v17 = vadd.f32 %v5235_v59, %v5204_v6  ;;  %v1637_v59 = vadd.f32 %v5204_v6, %v5308_v5 }
 0x1d7   : > { %3835 = vmatprep.subr.mxu1 %v2514_v23  ;;  %4277 = vmatprep.mubr.bf16.mxu0 %v4633_v21  ;;  %v2512_v55 = vmax.f32 %v1672_v26, 0.0  ;;  %v2490_v21 = vmax.f32 %v1584_v14, 0.0 }
 0x1d8   : > { %v5332_v25 = vpop.f32.mrf.mxu0  ;;  %3836 = vmatpush3.msra.mxu1 %v2498_v52  ;;  %v2489_v23 = vmax.f32 %v1581_v17, 0.0  ;;  %v2504_v52 = vmax.f32 %v1640_v63, 0.0  ;;  %v2503_v1 = vmax.f32 %v1637_v59, 0.0 }
 0x1d9   : > { %3837 = vmatprep.subr.mxu1 %v2513_v35  ;;  %v2488_v35 = vmax.f32 %v1576_v22, 0.0  ;;  %v4647_v22 = vld [vmem:[%s5055_s30 + $0x300] sm:$0xff]  }
 0x1da   : > { %v5337_v47 = vpop.f32.mrf.mxu0  ;;  %3838 = vmatpush3.msra.mxu1 %v2497_v42  ;;  %v1629_v42 = vadd.f32 %v5296_v38, %v5204_v6 }
 0x1db   : > { %3839 = vmatprep.subr.mxu1 %v2512_v55 }
 0x1dc   : > { %v5344_v60 = vpop.f32.mrf.mxu0  ;;  %3840 = vmatpush3.msra.mxu1 %v2496_v46  ;;  %v2486_v46 = vmax.f32 %v1568_v30, 0.0  ;;  %v2501_v40 = vmax.f32 %v1629_v42, 0.0 }
 0x1dd   : > { %3841 = vmatprep.subr.mxu1 %v2511_v53  ;;  %v2485_v53 = vmax.f32 %v1565_v44, 0.0 }
 0x1de   : > { %v5349_v39 = vpop.f32.mrf.mxu0  ;;  %4278 = vmatmul.mubr.bf16.gmra.mxu0 %v4634_v49  ;;  %3842 = vmatpush3.msra.mxu1 %v2495_v54  ;;  %v1560_v49 = vadd.f32 %v5204_v6, %v5230_v48 }
 0x1df   : > { %3843 = vmatprep.subr.mxu1 %v2510_v27  ;;  %4281 = vmatprep.mubr.bf16.mxu0 %v4635_v45  ;;  %v4640_v27 = vld [vmem:[%s5055_s30 + $0x2c8] sm:$0xff]  }
 0x1e0   : > { %v5354_v12 = vpop.f32.mrf.mxu0  ;;  %3844 = vmatpush3.msra.mxu1 %v2494_v43  ;;  %v2484_v48 = vmax.f32 %v1560_v49, 0.0  ;;  %v4641_v43 = vld [vmem:[%s5055_s30 + $0x2d0] sm:$0xff]  }
 0x1e1   : > { %3845 = vmatprep.subr.mxu1 %v2509_v8  ;;  %v2709_v8 = vld [vmem:[#allocation8 + $0x10] sm:$0xff] }
 0x1e2   : > { %v5360_v11 = vpop.f32.mrf.mxu0  ;;  %3846 = vmatpush3.msra.mxu1 %v2493_v58 }
 0x1e3   : > { %3847 = vmatprep.subr.mxu1 %v2508_v13  ;;  %v4643_v13 = vld [vmem:[%s5055_s30 + $0x2e0] sm:$0xff]  }
 0x1e4   : > { %v5368_v18 = vpop.f32.mrf.mxu0  ;;  %3848 = vmatpush3.msra.mxu1 %v2492_v32 }
 0x1e5   : > { %3849 = vmatprep.subr.mxu1 %v2507_v16  ;;  %v4644_v16 = vld [vmem:[%s5055_s30 + $0x2e8] sm:$0xff]  }
 0x1e6   : > { %v5374_v4 = vpop.f32.mrf.mxu0  ;;  %4282 = vmatmul.mubr.bf16.gmra.mxu0 %v4636_v15  ;;  %3850 = vmatpush3.msra.mxu1 %v2491_v7 }
 0x1e7   : > { %3851 = vmatprep.subr.mxu1 %v2506_v20  ;;  %4285 = vmatprep.mubr.bf16.mxu0 %v4637_v37  ;;  %v4645_v37 = vld [vmem:[%s5055_s30 + $0x2f0] sm:$0xff]  }
 0x1e8   : > { %v5380_v26 = vpop.f32.mrf.mxu0  ;;  %3852 = vmatpush3.msra.mxu1 %v2490_v21  ;;  %v4646_v21 = vld [vmem:[%s5055_s30 + $0x2f8] sm:$0xff]  }
 0x1e9   : > { %3853 = vmatprep.subr.mxu1 %v2505_v33 }
 0x1ea   : > { %v5386_v5 = vpop.f32.mrf.mxu0  ;;  %3854 = vmatpush3.msra.mxu1 %v2489_v23 }
 0x1eb   : > { %3855 = vmatprep.subr.mxu1 %v2504_v52  ;;  %v4648_v52 = vld [vmem:[%s5055_s30 + $0x308] sm:$0xff]   ;;  %v1728_v3 = vadd.f32 %v5386_v5, %v5204_v6 }
 0x1ec   : > { %v5394_v55 = vpop.f32.mrf.mxu0  ;;  %3856 = vmatpush3.msra.mxu1 %v2488_v35 }
 0x1ed   : > { %3857 = vmatprep.subr.mxu1 %v2503_v1  ;;  %v2526_v5 = vmax.f32 %v1728_v3, 0.0 }
 0x1ee   : > { %v4191_v38 = vpop.f32.mrf.mxu0  ;;  %4286 = vmatmul.mubr.bf16.gmra.mxu0 %v4638_v41  ;;  %3858 = vmatpush3.msra.mxu1 %v2487_v0 }
 0x1ef   : > { %3859 = vmatprep.subr.mxu1 %v2502_v31  ;;  %4289 = vmatprep.mubr.bf16.mxu0 %v4639_v50  ;;  %v1741_v41 = vadd.f32 %v4191_v38, %v5204_v6 }
 0x1f0   : > { %v5404_v45 = vpop.f32.mrf.mxu0  ;;  %3860 = vmatpush3.msra.mxu1 %v2486_v46 }
 0x1f1   : > { %3861 = vmatprep.subr.mxu1 %v2501_v40  ;;  %v2529_v49 = vmax.f32 %v1741_v41, 0.0  ;;  %v1733_v40 = vadd.f32 %v5204_v6, %v5404_v45  ;;  %v1725_v45 = vadd.f32 %v5374_v4, %v5204_v6  ;;  %v1701_v41 = vadd.f32 %v5204_v6, %v5354_v12 }
 0x1f2   : > { %v4192_v54 = vpop.f32.mrf.mxu0  ;;  %3862 = vmatpush3.msra.mxu1 %v2485_v53 }
 0x1f3   : > { %3863 = vmatprep.subr.mxu1 %v2500_v51  ;;  %v1744_v9 = vadd.f32 %v4192_v54, %v5204_v6  ;;  %v2525_v4 = vmax.f32 %v1725_v45, 0.0 }
 0x1f4   : > { %v1735_v2 = vpop.f32.mrf.mxu0  ;;  %3864 = vmatpush3.msra.mxu1 %v2484_v48 }
 0x1f5   : > { %3865 = vmatprep.subr.mxu1 %v2499_v57  ;;  %v2530_v44 = vmax.f32 %v1744_v9, 0.0  ;;  %v1736_v0 = vadd.f32 %v5204_v6, %v1735_v2  ;;  %v2527_v57 = vmax.f32 %v1733_v40, 0.0 }
 0x1f6   : > { %v5408_v56 = vpop.f32.mrf.mxu0  ;;  %4290 = vmatmul.mubr.bf16.gmra.mxu0 %v4640_v27  ;;  %3866 = vmatpush3.msra.mxu1 %v2483_v62 }
 0x1f7   : > { %4293 = vmatprep.mubr.bf16.mxu0 %v4641_v43  ;;  %2858 = vmatmul.mubr.f32.vlgmr.msra.gmra.mxu1 %v2709_v8  ;;  %v2528_v51 = vmax.f32 %v1736_v0, 0.0  ;;  %v1720_v8 = vadd.f32 %v5204_v6, %v5394_v55  ;;  %v1712_v55 = vadd.f32 %v5360_v11, %v5204_v6  ;;  %v1757_v12 = vadd.f32 %v5408_v56, %v5204_v6 }
 0x1f8   : > { %v5410_v58 = vpop.f32.mrf.mxu0  ;;  %2927 = vmatprep.mubr.f32.mxu1 %v2712_v24 }
 0x1f9   : > { %v2522_v9 = vmax.f32 %v1712_v55, 0.0  ;;  %v2533_v3 = vmax.f32 %v1757_v12, 0.0 }
 0x1fa   : > { %v5412_v34 = vpop.f32.mrf.mxu0 }
 0x1fc   : > { %v5416_v14 = vpop.f32.mrf.mxu0 }
 0x1fe   : > { %v5418_v32 = vpop.f32.mrf.mxu0  ;;  %4294 = vmatmul.mubr.bf16.gmra.mxu0 %v4642_v29 }
 0x1ff   : > { %4297 = vmatprep.mubr.bf16.mxu0 %v4643_v13 }
 0x200   : > { %v5420_v15 = vpop.f32.mrf.mxu0 }
 0x202   : > { %v5422_v61 = vpop.f32.mrf.mxu0 }
 0x204   : > { %v5426_v17 = vpop.f32.mrf.mxu0 }
 0x205   : > { %v1768_v11 = vadd.f32 %v5204_v6, %v5426_v17 }
 0x206   : > { %v4203_v7 = vpop.f32.mrf.mxu0  ;;  %4298 = vmatmul.mubr.bf16.gmra.mxu0 %v4644_v16  ;;  %v1717_v16 = vadd.f32 %v5204_v6, %v5380_v26  ;;  %v1709_v26 = vadd.f32 %v5349_v39, %v5204_v6  ;;  %v1765_v39 = vadd.f32 %v5204_v6, %v5420_v15 }
 0x207   : > { %4301 = vmatprep.mubr.bf16.mxu0 %v4645_v37  ;;  %v1789_v54 = vadd.f32 %v4203_v7, %v5204_v6  ;;  %v1776_v7 = vadd.f32 %v5422_v61, %v5204_v6 }
 0x208   : > { %v1780_v20 = vpop.f32.mrf.mxu0  ;;  %v2535_v0 = vmax.f32 %v1765_v39, 0.0 }
 0x209   : > { %v2541_v29 = vmax.f32 %v1789_v54, 0.0  ;;  %v1781_v13 = vadd.f32 %v5204_v6, %v1780_v20  ;;  %v1773_v20 = vadd.f32 %v5418_v32, %v5204_v6  ;;  %v2538_v61 = vmax.f32 %v1776_v7, 0.0  ;;  %v5482_v32 = vpop.f32.mrf.mxu1 }
 0x20a   : > { %v4204_v63 = vpop.f32.mrf.mxu0  ;;  %6047 = vst [vmem:[#allocation16_spill] sm:$0xff] %v5482_v32  ;;  %v1685_v54 = vadd.f32 %v5204_v6, %v5332_v25 }
 0x20b   : > { %v1792_v38 = vadd.f32 %v4204_v63, %v5204_v6  ;;  %v5496_v15 = vpop.f32.mrf.mxu1 }
 0x20c   : > { %v1783_v33 = vpop.f32.mrf.mxu0  ;;  %6048 = vst [vmem:[#allocation17_spill] sm:$0xff] %v5496_v15 }
 0x20d   : > { %v2542_v62 = vmax.f32 %v1792_v38, 0.0  ;;  %v1784_v2 = vadd.f32 %v5204_v6, %v1783_v33  ;;  %v2539_v33 = vmax.f32 %v1781_v13, 0.0  ;;  %v1688_v38 = vadd.f32 %v5204_v6, %v5344_v60  ;;  %v5508_v56 = vpop.f32.mrf.mxu1 }
 0x20e   : > { %v4207_v59 = vpop.f32.mrf.mxu0  ;;  %4302 = vmatmul.mubr.bf16.gmra.mxu0 %v4646_v21  ;;  %v2524_v21 = vmax.f32 %v1720_v8, 0.0  ;;  %v2714_v8 = vld [vmem:[#allocation8 + $0x38] sm:$0xff] }
 0x20f   : > { %4305 = vmatprep.mubr.bf16.mxu0 %v4647_v22  ;;  %v1805_v30 = vadd.f32 %v4207_v59, %v5204_v6  ;;  %v2540_v63 = vmax.f32 %v1784_v2, 0.0  ;;  %v2523_v59 = vmax.f32 %v1717_v16, 0.0  ;;  %v2516_v45 = vmax.f32 %v1688_v38, 0.0  ;;  %v5514_v60 = vpop.f32.mrf.mxu1 }
 0x210   : > { %v1796_v23 = vpop.f32.mrf.mxu0  ;;  %6049 = vst [vmem:[#allocation18_spill] sm:$0xff] %v5514_v60  ;;  %v2515_v2 = vmax.f32 %v1685_v54, 0.0 }
 0x211   : > { %v2545_v36 = vmax.f32 %v1805_v30, 0.0  ;;  %v1797_v46 = vadd.f32 %v5204_v6, %v1796_v23  ;;  %v2537_v30 = vmax.f32 %v1773_v20, 0.0  ;;  %v5518_v25 = vpop.f32.mrf.mxu1 }
 0x212   : > { %v4208_v10 = vpop.f32.mrf.mxu0 }
 0x213   : > { %v1808_v35 = vadd.f32 %v4208_v10, %v5204_v6  ;;  %v2543_v27 = vmax.f32 %v1797_v46, 0.0  ;;  %v1704_v10 = vadd.f32 %v5204_v6, %v5368_v18  ;;  %v1760_v18 = vadd.f32 %v5412_v34, %v5204_v6  ;;  %v5524_v16 = vpop.f32.mrf.mxu1 }
 0x214   : > { %v1799_v42 = vpop.f32.mrf.mxu0  ;;  %v2519_v34 = vmax.f32 %v1701_v41, 0.0 }
 0x215   : > { %v2546_v1 = vmax.f32 %v1808_v35, 0.0  ;;  %v1800_v50 = vadd.f32 %v5204_v6, %v1799_v42  ;;  %v2521_v35 = vmax.f32 %v1709_v26, 0.0  ;;  %v2536_v42 = vmax.f32 %v1768_v11, 0.0  ;;  %v5530_v55 = vpop.f32.mrf.mxu1 }
 0x216   : > { %v5437_v31 = vpop.f32.mrf.mxu0  ;;  %4306 = vmatmul.mubr.bf16.gmra.mxu0 %v4648_v52 }
 0x217   : > { %3870 = vmatprep.subr.mxu1 %v2546_v1  ;;  %v2544_v53 = vmax.f32 %v1800_v50, 0.0  ;;  %v1696_v1 = vadd.f32 %v5337_v47, %v5204_v6  ;;  %v2520_v50 = vmax.f32 %v1704_v10, 0.0  ;;  %v1752_v47 = vadd.f32 %v5204_v6, %v5416_v14 }
 0x218   : > { %v5442_v19 = vpop.f32.mrf.mxu0  ;;  %3871 = vmatpush3.msra.mxu1 %v2530_v44 }
 0x219   : > { %3872 = vmatprep.subr.mxu1 %v2545_v36  ;;  %v1693_v36 = vadd.f32 %v5327_v28, %v5204_v6  ;;  %v2518_v40 = vmax.f32 %v1696_v1, 0.0  ;;  %v1749_v28 = vadd.f32 %v5204_v6, %v5410_v58  ;;  %v2532_v14 = vmax.f32 %v1752_v47, 0.0  ;;  %v2711_v58 = vld [vmem:[#allocation8 + $0x20] sm:$0xff] }
 0x21a   : > { %v5447_v48 = vpop.f32.mrf.mxu0  ;;  %3873 = vmatpush3.msra.mxu1 %v2529_v49  ;;  %v2534_v49 = vmax.f32 %v1760_v18, 0.0 }
 0x21b   : > { %3874 = vmatprep.subr.mxu1 %v2544_v53 }
 0x21c   : > { %v5452_v43 = vpop.f32.mrf.mxu0  ;;  %3875 = vmatpush3.msra.mxu1 %v2528_v51  ;;  %v2517_v51 = vmax.f32 %v1693_v36, 0.0 }
 0x21d   : > { %3876 = vmatprep.subr.mxu1 %v2543_v27 }
 0x21e   : > { %v5457_v24 = vpop.f32.mrf.mxu0  ;;  %3877 = vmatpush3.msra.mxu1 %v2527_v57 }
 0x21f   : > { %3878 = vmatprep.subr.mxu1 %v2542_v62  ;;  %v2531_v62 = vmax.f32 %v1749_v28, 0.0 }
 0x220   : > { %v5462_v37 = vpop.f32.mrf.mxu0  ;;  %3879 = vmatpush3.msra.mxu1 %v2526_v5 }
 0x221   : > { %3880 = vmatprep.subr.mxu1 %v2541_v29 }
 0x222   : > { %v5468_v22 = vpop.f32.mrf.mxu0  ;;  %3881 = vmatpush3.msra.mxu1 %v2525_v4 }
 0x223   : > { %3882 = vmatprep.subr.mxu1 %v2540_v63 }
 0x224   : > { %v5474_v23 = vpop.f32.mrf.mxu0  ;;  %3883 = vmatpush3.msra.mxu1 %v2524_v21 }
 0x225   : > { %3884 = vmatprep.subr.mxu1 %v2539_v33  ;;  %v5536_v33 = vpop.f32.mrf.mxu1 }
 0x226   : > { %v5480_v52 = vpop.f32.mrf.mxu0  ;;  %3885 = vmatpush3.msra.mxu1 %v2523_v59 }
 0x227   : > { %3886 = vmatprep.subr.mxu1 %v2538_v61  ;;  %v5540_v61 = vpop.f32.mrf.mxu1 }
 0x228   : > { %v5488_v17 = vpop.f32.mrf.mxu0  ;;  %3887 = vmatpush3.msra.mxu1 %v2522_v9 }
 0x229   : > { %3888 = vmatprep.subr.mxu1 %v2537_v30  ;;  %v5542_v10 = vpop.f32.mrf.mxu1 }
 0x22a   : > { %v5494_v44 = vpop.f32.mrf.mxu0  ;;  %3889 = vmatpush3.msra.mxu1 %v2521_v35 }
 0x22b   : > { %3890 = vmatprep.subr.mxu1 %v2536_v42  ;;  %v5544_v35 = vpop.f32.mrf.mxu1 }
 0x22c   : > { %v5502_v46 = vpop.f32.mrf.mxu0  ;;  %3891 = vmatpush3.msra.mxu1 %v2520_v50 }
 0x22d   : > { %3892 = vmatprep.subr.mxu1 %v2535_v0  ;;  %v5547_v1 = vpop.f32.mrf.mxu1 }
 0x22e   : > { %v4223_v53 = vpop.f32.mrf.mxu0  ;;  %3893 = vmatpush3.msra.mxu1 %v2519_v34 }
 0x22f   : > { %3894 = vmatprep.subr.mxu1 %v2534_v49  ;;  %v1869_v0 = vadd.f32 %v4223_v53, %v5204_v6 }
 0x230   : > { %v1860_v27 = vpop.f32.mrf.mxu0  ;;  %3895 = vmatpush3.msra.mxu1 %v2518_v40 }
 0x231   : > { %3896 = vmatprep.subr.mxu1 %v2533_v3  ;;  %v5556_v3 = vpop.f32.mrf.mxu1  ;;  %v2561_v54 = vmax.f32 %v1869_v0, 0.0 }
 0x232   : > { %v4224_v57 = vpop.f32.mrf.mxu0  ;;  %3897 = vmatpush3.msra.mxu1 %v2517_v51  ;;  %6050 = vst [vmem:[#allocation19_spill] sm:$0xff] %v5556_v3 }
 0x233   : > { %3898 = vmatprep.subr.mxu1 %v2532_v14  ;;  %v1872_v18 = vadd.f32 %v4224_v57, %v5204_v6  ;;  %v1861_v14 = vadd.f32 %v5204_v6, %v1860_v27  ;;  %v1853_v27 = vadd.f32 %v5480_v52, %v5204_v6 }
 0x234   : > { %v1863_v5 = vpop.f32.mrf.mxu0  ;;  %3899 = vmatpush3.msra.mxu1 %v2516_v45 }
 0x235   : > { %3900 = vmatprep.subr.mxu1 %v2531_v62  ;;  %v2562_v47 = vmax.f32 %v1872_v18, 0.0  ;;  %v1864_v40 = vadd.f32 %v5204_v6, %v1863_v5  ;;  %v1856_v62 = vadd.f32 %v5494_v44, %v5204_v6 }
 0x236   : > { %v5516_v29 = vpop.f32.mrf.mxu0  ;;  %3901 = vmatpush3.msra.mxu1 %v2515_v2 }
 0x237   : > { %2928 = vmatmul.mubr.f32.vlgmr.msra.gmra.mxu1 %v2711_v58  ;;  %v2560_v2 = vmax.f32 %v1864_v40, 0.0  ;;  %v5567_v58 = vpop.f32.mrf.mxu1 }
 0x238   : > { %v5520_v13 = vpop.f32.mrf.mxu0  ;;  %2997 = vmatprep.mubr.f32.mxu1 %v2714_v8  ;;  %6051 = vst [vmem:[#allocation20_spill] sm:$0xff] %v5567_v58 }
 0x239   : > { %v5581_v0 = vpop.f32.mrf.mxu1 }
 0x23a   : > { %v5522_v4 = vpop.f32.mrf.mxu0  ;;  %6052 = vst [vmem:[#allocation21_spill] sm:$0xff] %v5581_v0 }
 0x23c   : > { %v5526_v7 = vpop.f32.mrf.mxu0 }
 0x23e   : > { %v5528_v63 = vpop.f32.mrf.mxu0 }
 0x240   : > { %v5532_v21 = vpop.f32.mrf.mxu0 }
 0x242   : > { %v5534_v20 = vpop.f32.mrf.mxu0 }
 0x244   : > { %v5538_v26 = vpop.f32.mrf.mxu0 }
 0x246   : > { %v4235_v59 = vpop.f32.mrf.mxu0 }
 0x247   : > { %v1917_v8 = vadd.f32 %v4235_v59, %v5204_v6 }
 0x248   : > { %v1908_v11 = vpop.f32.mrf.mxu0 }
 0x249   : > { %v2573_v52 = vmax.f32 %v1917_v8, 0.0 }
 0x24a   : > { %v4236_v9 = vpop.f32.mrf.mxu0 }
 0x24b   : > { %v1920_v53 = vadd.f32 %v4236_v9, %v5204_v6 }
 0x24c   : > { %v1911_v30 = vpop.f32.mrf.mxu0 }
 0x24d   : > { %v2574_v18 = vmax.f32 %v1920_v53, 0.0  ;;  %v1912_v44 = vadd.f32 %v5204_v6, %v1911_v30 }
 0x24e   : > { %v4239_v39 = vpop.f32.mrf.mxu0 }
 0x24f   : > { %v1933_v50 = vadd.f32 %v4239_v39, %v5204_v6 }
 0x250   : > { %v1924_v41 = vpop.f32.mrf.mxu0 }
 0x251   : > { %v2577_v28 = vmax.f32 %v1933_v50, 0.0  ;;  %v1925_v51 = vadd.f32 %v5204_v6, %v1924_v41  ;;  %v2559_v41 = vmax.f32 %v1861_v14, 0.0  ;;  %v5575_v50 = vld [vmem:[#allocation7] ss:$0 sm:$0xff] }
 0x252   : > { %v4240_v42 = vpop.f32.mrf.mxu0 }
 0x253   : > { %v1936_v12 = vadd.f32 %v4240_v42, %v5204_v6  ;;  %v2575_v39 = vmax.f32 %v1925_v51, 0.0  ;;  %v2558_v42 = vmax.f32 %v1856_v62, 0.0  ;;  %v1832_v62 = vadd.f32 %v5575_v50, %v5474_v23 }
 0x254   : > { %v1927_v36 = vpop.f32.mrf.mxu0  ;;  %v1888_v23 = vadd.f32 %v5575_v50, %v5522_v4 }
 0x255   : > { %v2578_v34 = vmax.f32 %v1936_v12, 0.0  ;;  %v1928_v49 = vadd.f32 %v5204_v6, %v1927_v36  ;;  %v1848_v12 = vadd.f32 %v5575_v50, %v5502_v46  ;;  %v1909_v36 = vadd.f32 %v5575_v50, %v1908_v11  ;;  %v5594_v11 = vpop.f32.mrf.mxu1 }
 0x256   : > { %v5554_v38 = vpop.f32.mrf.mxu0  ;;  %v1845_v6 = vadd.f32 %v5575_v50, %v5488_v17  ;;  %v2572_v46 = vmax.f32 %v1912_v44, 0.0  ;;  %6053 = vst [vmem:[#allocation22_spill] sm:$0xff] %v5594_v11  ;;  %v1901_v17 = vadd.f32 %v5575_v50, %v5528_v63  ;;  %v2552_v44 = vmax.f32 %v1832_v62, 0.0  ;;  %v2716_v62 = vld [vmem:[#allocation8 + $0x48] sm:$0xff] }
 0x257   : > { %3905 = vmatprep.subr.mxu1 %v2578_v34  ;;  %v2576_v57 = vmax.f32 %v1928_v49, 0.0  ;;  %v2557_v34 = vmax.f32 %v1853_v27, 0.0  ;;  %v1904_v49 = vadd.f32 %v5575_v50, %v5534_v20  ;;  %v2556_v40 = vmax.f32 %v1848_v12, 0.0  ;;  %v5608_v63 = vpop.f32.mrf.mxu1 }
 0x258   : > { %v5560_v45 = vpop.f32.mrf.mxu0  ;;  %3906 = vmatpush3.msra.mxu1 %v2562_v47  ;;  %v1840_v47 = vadd.f32 %v5575_v50, %v5468_v22  ;;  %v2571_v51 = vmax.f32 %v1909_v36, 0.0  ;;  %v2555_v20 = vmax.f32 %v1845_v6, 0.0  ;;  %v1896_v22 = vadd.f32 %v5575_v50, %v5538_v26 }
 0x259   : > { %3907 = vmatprep.subr.mxu1 %v2577_v28  ;;  %v2570_v53 = vmax.f32 %v1904_v49, 0.0  ;;  %v2569_v8 = vmax.f32 %v1901_v17, 0.0  ;;  %v1829_v27 = vadd.f32 %v5575_v50, %v5462_v37  ;;  %v1885_v37 = vadd.f32 %v5575_v50, %v5516_v29 }
 0x25a   : > { %v5565_v5 = vpop.f32.mrf.mxu0  ;;  %3908 = vmatpush3.msra.mxu1 %v2561_v54  ;;  %v1837_v54 = vadd.f32 %v5575_v50, %v5457_v24  ;;  %v1893_v24 = vadd.f32 %v5575_v50, %v5532_v21  ;;  %v5622_v21 = vpop.f32.mrf.mxu1  ;;  %v1816_v49 = vadd.f32 %v5575_v50, %v5452_v43  ;;  %v1813_v17 = vadd.f32 %v5575_v50, %v5442_v19 }
 0x25b   : > { %3909 = vmatprep.subr.mxu1 %v2576_v57  ;;  %v2554_v57 = vmax.f32 %v1840_v47, 0.0  ;;  %6054 = vst [vmem:[#allocation23_spill] sm:$0xff] %v5622_v21  ;;  %v2551_v4 = vmax.f32 %v1829_v27, 0.0  ;;  %v2565_v47 = vmax.f32 %v1885_v37, 0.0 }
 0x25c   : > { %v5572_v9 = vpop.f32.mrf.mxu0  ;;  %3910 = vmatpush3.msra.mxu1 %v2560_v2  ;;  %v2567_v12 = vmax.f32 %v1893_v24, 0.0  ;;  %v5634_v29 = vpop.f32.mrf.mxu1 }
 0x25d   : > { %3911 = vmatprep.subr.mxu1 %v2575_v39  ;;  %v2553_v39 = vmax.f32 %v1837_v54, 0.0  ;;  %v2548_v54 = vmax.f32 %v1816_v49, 0.0 }
 0x25e   : > { %v5579_v59 = vpop.f32.mrf.mxu0  ;;  %3912 = vmatpush3.msra.mxu1 %v2559_v41  ;;  %v2568_v41 = vmax.f32 %v1896_v22, 0.0  ;;  %v5640_v43 = vpop.f32.mrf.mxu1  ;;  %v2547_v22 = vmax.f32 %v1813_v17, 0.0 }
 0x25f   : > { %3913 = vmatprep.subr.mxu1 %v2574_v18  ;;  %v1824_v18 = vadd.f32 %v5575_v50, %v5447_v48  ;;  %v1880_v48 = vadd.f32 %v5575_v50, %v5526_v7  ;;  %6055 = vst [vmem:[#allocation24_spill] sm:$0xff] %v5640_v43 }
 0x260   : > { %v5586_v30 = vpop.f32.mrf.mxu0  ;;  %3914 = vmatpush3.msra.mxu1 %v2558_v42  ;;  %v5644_v19 = vpop.f32.mrf.mxu1 }
 0x261   : > { %3915 = vmatprep.subr.mxu1 %v2573_v52  ;;  %v1821_v52 = vadd.f32 %v5575_v50, %v5437_v31  ;;  %v2550_v6 = vmax.f32 %v1824_v18, 0.0  ;;  %v1877_v31 = vadd.f32 %v5575_v50, %v5520_v13  ;;  %v2564_v7 = vmax.f32 %v1880_v48, 0.0  ;;  %v2713_v13 = vld [vmem:[#allocation8 + $0x30] sm:$0xff] }
 0x262   : > { %v5592_v28 = vpop.f32.mrf.mxu0  ;;  %3916 = vmatpush3.msra.mxu1 %v2557_v34  ;;  %v2566_v34 = vmax.f32 %v1888_v23, 0.0  ;;  %v5650_v27 = vpop.f32.mrf.mxu1 }
 0x263   : > { %3917 = vmatprep.subr.mxu1 %v2572_v46 }
 0x264   : > { %v5600_v14 = vpop.f32.mrf.mxu0  ;;  %3918 = vmatpush3.msra.mxu1 %v2556_v40  ;;  %v2549_v40 = vmax.f32 %v1821_v52, 0.0  ;;  %v5656_v18 = vpop.f32.mrf.mxu1 }
 0x265   : > { %3919 = vmatprep.subr.mxu1 %v2571_v51 }
 0x266   : > { %v5606_v2 = vpop.f32.mrf.mxu0  ;;  %3920 = vmatpush3.msra.mxu1 %v2555_v20 }
 0x267   : > { %3921 = vmatprep.subr.mxu1 %v2570_v53  ;;  %v2563_v53 = vmax.f32 %v1877_v31, 0.0 }
 0x268   : > { %v5614_v26 = vpop.f32.mrf.mxu0  ;;  %3922 = vmatpush3.msra.mxu1 %v2554_v57 }
 0x269   : > { %3923 = vmatprep.subr.mxu1 %v2569_v8 }
 0x26a   : > { %v5620_v42 = vpop.f32.mrf.mxu0  ;;  %3924 = vmatpush3.msra.mxu1 %v2553_v39 }
 0x26b   : > { %3925 = vmatprep.subr.mxu1 %v2568_v41 }
 0x26c   : > { %v5628_v36 = vpop.f32.mrf.mxu0  ;;  %3926 = vmatpush3.msra.mxu1 %v2552_v44 }
 0x26d   : > { %3927 = vmatprep.subr.mxu1 %v2567_v12  ;;  %v5660_v12 = vpop.f32.mrf.mxu1 }
 0x26e   : > { %v4255_v46 = vpop.f32.mrf.mxu0  ;;  %3928 = vmatpush3.msra.mxu1 %v2551_v4 }
 0x26f   : > { %3929 = vmatprep.subr.mxu1 %v2566_v34  ;;  %v5664_v34 = vpop.f32.mrf.mxu1 }
 0x270   : > { %v1988_v51 = vpop.f32.mrf.mxu0  ;;  %3930 = vmatpush3.msra.mxu1 %v2550_v6 }
 0x271   : > { %3931 = vmatprep.subr.mxu1 %v2565_v47  ;;  %v5666_v49 = vpop.f32.mrf.mxu1 }
 0x272   : > { %v4256_v20 = vpop.f32.mrf.mxu0  ;;  %3932 = vmatpush3.msra.mxu1 %v2549_v40 }
 0x273   : > { %3933 = vmatprep.subr.mxu1 %v2564_v7  ;;  %v5668_v40 = vpop.f32.mrf.mxu1  ;;  %v2000_v7 = vadd.f32 %v5575_v50, %v4256_v20 }
 0x274   : > { %v1991_v57 = vpop.f32.mrf.mxu0  ;;  %3934 = vmatpush3.msra.mxu1 %v2548_v54 }
 0x275   : > { %3935 = vmatprep.subr.mxu1 %v2563_v53  ;;  %v5671_v53 = vpop.f32.mrf.mxu1  ;;  %v2594_v0 = vmax.f32 %v2000_v7, 0.0  ;;  %v1992_v15 = vadd.f32 %v5575_v50, %v1991_v57  ;;  %v1984_v57 = vadd.f32 %v5575_v50, %v5620_v42 }
 0x276   : > { %v5642_v8 = vpop.f32.mrf.mxu0  ;;  %3936 = vmatpush3.msra.mxu1 %v2547_v22 }
 0x277   : > { %2998 = vmatmul.mubr.f32.vlgmr.msra.gmra.mxu1 %v2713_v13  ;;  %v5680_v60 = vpop.f32.mrf.mxu1  ;;  %v2592_v7 = vmax.f32 %v1992_v15, 0.0  ;;  %v2590_v15 = vmax.f32 %v1984_v57, 0.0 }
 0x278   : > { %v5646_v24 = vpop.f32.mrf.mxu0  ;;  %3067 = vmatprep.mubr.f32.mxu1 %v2716_v62  ;;  %v1997_v62 = vadd.f32 %v5575_v50, %v4255_v46  ;;  %6056 = vst [vmem:[#allocation25_spill] sm:$0xff] %v5680_v60 }
 0x27a   : > { %v5648_v39 = vpop.f32.mrf.mxu0 }
 0x27c   : > { %v5652_v23 = vpop.f32.mrf.mxu0 }
 0x27e   : > { %v5654_v41 = vpop.f32.mrf.mxu0 }
 0x280   : > { %v5658_v44 = vpop.f32.mrf.mxu0 }
 0x282   : > { %v4264_v37 = vpop.f32.mrf.mxu0 }
 0x284   : > { %v5662_v52 = vpop.f32.mrf.mxu0 }
 0x286   : > { %v4267_v4 = vpop.f32.mrf.mxu0 }
 0x288   : > { %v2036_v48 = vpop.f32.mrf.mxu0 }
 0x28a   : > { %v4268_v6 = vpop.f32.mrf.mxu0 }
 0x28b   : > { %v2048_v46 = vadd.f32 %v5575_v50, %v4268_v6 }
 0x28c   : > { %v2039_v47 = vpop.f32.mrf.mxu0 }
 0x28d   : > { %v2040_v42 = vadd.f32 %v5575_v50, %v2039_v47  ;;  %v2032_v47 = vadd.f32 %v5575_v50, %v4264_v37 }
 0x28e   : > { %v4271_v31 = vpop.f32.mrf.mxu0 }
 0x28f   : > { %v2061_v22 = vadd.f32 %v5575_v50, %v4271_v31  ;;  %v2593_v31 = vmax.f32 %v1997_v62, 0.0  ;;  %v1976_v62 = vadd.f32 %v5575_v50, %v5628_v36  ;;  %v1968_v36 = vadd.f32 %v5575_v50, %v5592_v28 }
 0x290   : > { %v2052_v17 = vpop.f32.mrf.mxu0  ;;  %v2024_v28 = vadd.f32 %v5575_v50, %v5662_v52 }
 0x291   : > { %v2609_v20 = vmax.f32 %v2061_v22, 0.0  ;;  %v2053_v43 = vadd.f32 %v5575_v50, %v2052_v17  ;;  %v5691_v22 = vpop.f32.mrf.mxu1  ;;  %v2588_v57 = vmax.f32 %v1976_v62, 0.0 }
 0x292   : > { %v4272_v54 = vpop.f32.mrf.mxu0  ;;  %6057 = vst [vmem:[#allocation26_spill] sm:$0xff] %v5691_v22 }
 0x293   : > { %v2064_v13 = vadd.f32 %v5575_v50, %v4272_v54  ;;  %v1989_v54 = vadd.f32 %v5575_v50, %v1988_v51  ;;  %v2607_v17 = vmax.f32 %v2053_v43, 0.0  ;;  %v5703_v43 = vpop.f32.mrf.mxu1 }
 0x294   : > { %v2055_v58 = vpop.f32.mrf.mxu0  ;;  %6058 = vst [vmem:[#allocation27_spill] sm:$0xff] %v5703_v43 }
 0x295   : > { %v2610_v11 = vmax.f32 %v2064_v13, 0.0  ;;  %v2056_v3 = vadd.f32 %v5575_v50, %v2055_v58  ;;  %v2591_v51 = vmax.f32 %v1989_v54, 0.0  ;;  %v1973_v54 = vadd.f32 %v5575_v50, %v5614_v26 }
 0x296   : > { %v5678_v21 = vpop.f32.mrf.mxu0 }
 0x297   : > { %3940 = vmatprep.subr.mxu1 %v2610_v11  ;;  %v2608_v58 = vmax.f32 %v2056_v3, 0.0  ;;  %v2045_v11 = vadd.f32 %v5575_v50, %v4267_v4  ;;  %v2606_v3 = vmax.f32 %v2048_v46, 0.0  ;;  %v2587_v37 = vmax.f32 %v1973_v54, 0.0 }
 0x298   : > { %v5684_v32 = vpop.f32.mrf.mxu0  ;;  %3941 = vmatpush3.msra.mxu1 %v2594_v0  ;;  %v1981_v0 = vadd.f32 %v5575_v50, %v5606_v2  ;;  %v2037_v2 = vadd.f32 %v5575_v50, %v2036_v48  ;;  %v5715_v48 = vpop.f32.mrf.mxu1  ;;  %v1952_v54 = vadd.f32 %v5575_v50, %v5565_v5  ;;  %v2008_v5 = vadd.f32 %v5575_v50, %v5652_v23 }
 0x299   : > { %3942 = vmatprep.subr.mxu1 %v2609_v20  ;;  %v2605_v4 = vmax.f32 %v2045_v11, 0.0  ;;  %6059 = vst [vmem:[#allocation28_spill] sm:$0xff] %v5715_v48  ;;  %v2029_v11 = vadd.f32 %v5575_v50, %v5654_v41 }
 0x29a   : > { %v5689_v13 = vpop.f32.mrf.mxu0  ;;  %3943 = vmatpush3.msra.mxu1 %v2593_v31  ;;  %v2589_v31 = vmax.f32 %v1981_v0, 0.0  ;;  %v2603_v26 = vmax.f32 %v2037_v2, 0.0  ;;  %v5729_v41 = vpop.f32.mrf.mxu1  ;;  %v1957_v2 = vadd.f32 %v5575_v50, %v5586_v30  ;;  %v2013_v30 = vadd.f32 %v5575_v50, %v5642_v8 }
 0x29b   : > { %3944 = vmatprep.subr.mxu1 %v2608_v58  ;;  %v2604_v58 = vmax.f32 %v2040_v42, 0.0  ;;  %v1960_v42 = vadd.f32 %v5575_v50, %v5600_v14  ;;  %6060 = vst [vmem:[#allocation29_spill] sm:$0xff] %v5729_v41  ;;  %v2601_v62 = vmax.f32 %v2029_v11, 0.0  ;;  %v2016_v14 = vadd.f32 %v5575_v50, %v5648_v39 }
 0x29c   : > { %v5696_v6 = vpop.f32.mrf.mxu0  ;;  %3945 = vmatpush3.msra.mxu1 %v2592_v7  ;;  %v2583_v39 = vmax.f32 %v1957_v2, 0.0  ;;  %v2596_v23 = vmax.f32 %v2008_v5, 0.0 }
 0x29d   : > { %3946 = vmatprep.subr.mxu1 %v2607_v17  ;;  %v1965_v17 = vadd.f32 %v5575_v50, %v5579_v59  ;;  %v2021_v59 = vadd.f32 %v5575_v50, %v5658_v44  ;;  %v5743_v44 = vpop.f32.mrf.mxu1 }
 0x29e   : > { %v5701_v20 = vpop.f32.mrf.mxu0  ;;  %3947 = vmatpush3.msra.mxu1 %v2591_v51  ;;  %v2602_v51 = vmax.f32 %v2032_v47, 0.0  ;;  %v2584_v47 = vmax.f32 %v1960_v42, 0.0  ;;  %6061 = vst [vmem:[#allocation30_spill] sm:$0xff] %v5743_v44  ;;  %v1941_v42 = vadd.f32 %v5575_v50, %v5560_v45 }
 0x29f   : > { %3948 = vmatprep.subr.mxu1 %v2606_v3  ;;  %v2586_v3 = vmax.f32 %v1968_v36, 0.0  ;;  %v2599_v36 = vmax.f32 %v2021_v59, 0.0  ;;  %v5755_v8 = vpop.f32.mrf.mxu1 }
 0x2a0   : > { %v5708_v46 = vpop.f32.mrf.mxu0  ;;  %3949 = vmatpush3.msra.mxu1 %v2590_v15  ;;  %6062 = vst [vmem:[#allocation31_spill] sm:$0xff] %v5755_v8 }
 0x2a1   : > { %3950 = vmatprep.subr.mxu1 %v2605_v4  ;;  %v2585_v4 = vmax.f32 %v1965_v17, 0.0  ;;  %v2582_v17 = vmax.f32 %v1952_v54, 0.0  ;;  %v2718_v54 = vld [vmem:[#allocation8 + $0x58] sm:$0xff] }
 0x2a2   : > { %v5713_v7 = vpop.f32.mrf.mxu0  ;;  %3951 = vmatpush3.msra.mxu1 %v2589_v31  ;;  %v2600_v31 = vmax.f32 %v2024_v28, 0.0  ;;  %v2597_v28 = vmax.f32 %v2013_v30, 0.0 }
 0x2a3   : > { %3952 = vmatprep.subr.mxu1 %v2604_v58 }
 0x2a4   : > { %v5721_v0 = vpop.f32.mrf.mxu0  ;;  %3953 = vmatpush3.msra.mxu1 %v2588_v57  ;;  %v1949_v57 = vadd.f32 %v5575_v50, %v5554_v38  ;;  %v2005_v38 = vadd.f32 %v5575_v50, %v5646_v24  ;;  %v2715_v24 = vld [vmem:[#allocation8 + $0x40] sm:$0xff] }
 0x2a5   : > { %3954 = vmatprep.subr.mxu1 %v2603_v26  ;;  %v2598_v26 = vmax.f32 %v2016_v14, 0.0  ;;  %v2579_v14 = vmax.f32 %v1941_v42, 0.0 }
 0x2a6   : > { %v5727_v15 = vpop.f32.mrf.mxu0  ;;  %3955 = vmatpush3.msra.mxu1 %v2587_v37  ;;  %v1944_v37 = vadd.f32 %v5575_v50, %v5572_v9  ;;  %v5761_v9 = vpop.f32.mrf.mxu1  ;;  %v2595_v2 = vmax.f32 %v2005_v38, 0.0 }
 0x2a7   : > { %3956 = vmatprep.subr.mxu1 %v2602_v51  ;;  %6063 = vst [vmem:[#allocation32_spill] sm:$0xff] %v5761_v9 }
 0x2a8   : > { %v5735_v52 = vpop.f32.mrf.mxu0  ;;  %3957 = vmatpush3.msra.mxu1 %v2586_v3  ;;  %v2581_v3 = vmax.f32 %v1949_v57, 0.0  ;;  %v2580_v59 = vmax.f32 %v1944_v37, 0.0  ;;  %v5765_v45 = vpop.f32.mrf.mxu1 }
 0x2a9   : > { %3958 = vmatprep.subr.mxu1 %v2601_v62  ;;  %6064 = vst [vmem:[#allocation33_spill] sm:$0xff] %v5765_v45 }
 0x2aa   : > { %v5741_v58 = vpop.f32.mrf.mxu0  ;;  %3959 = vmatpush3.msra.mxu1 %v2585_v4  ;;  %v5771_v57 = vpop.f32.mrf.mxu1 }
 0x2ab   : > { %3960 = vmatprep.subr.mxu1 %v2600_v31  ;;  %6065 = vst [vmem:[#allocation34_spill] sm:$0xff] %v5771_v57 }
 0x2ac   : > { %v5749_v11 = vpop.f32.mrf.mxu0  ;;  %3961 = vmatpush3.msra.mxu1 %v2584_v47  ;;  %v5777_v5 = vpop.f32.mrf.mxu1 }
 0x2ad   : > { %3962 = vmatprep.subr.mxu1 %v2599_v36  ;;  %6066 = vst [vmem:[#allocation35_spill] sm:$0xff] %v5777_v5 }
 0x2ae   : > { %v4287_v51 = vpop.f32.mrf.mxu0  ;;  %3963 = vmatpush3.msra.mxu1 %v2583_v39 }
 0x2af   : > { %3964 = vmatprep.subr.mxu1 %v2598_v26  ;;  %v2125_v41 = vadd.f32 %v5575_v50, %v4287_v51 }
 0x2b0   : > { %v2116_v62 = vpop.f32.mrf.mxu0  ;;  %3965 = vmatpush3.msra.mxu1 %v2582_v17 }
 0x2b1   : > { %3966 = vmatprep.subr.mxu1 %v2597_v28  ;;  %v5781_v28 = vpop.f32.mrf.mxu1 }
 0x2b2   : > { %v4288_v4 = vpop.f32.mrf.mxu0  ;;  %3967 = vmatpush3.msra.mxu1 %v2581_v3  ;;  %6067 = vst [vmem:[#allocation36_spill] sm:$0xff] %v5781_v28 }
 0x2b3   : > { %3968 = vmatprep.subr.mxu1 %v2596_v23  ;;  %v5785_v42 = vpop.f32.mrf.mxu1  ;;  %v2128_v48 = vadd.f32 %v5575_v50, %v4288_v4 }
 0x2b4   : > { %v2119_v31 = vpop.f32.mrf.mxu0  ;;  %3969 = vmatpush3.msra.mxu1 %v2580_v59  ;;  %6068 = vst [vmem:[#allocation37_spill] sm:$0xff] %v5785_v42 }
 0x2b5   : > { %3970 = vmatprep.subr.mxu1 %v2595_v2  ;;  %v5787_v2 = vpop.f32.mrf.mxu1  ;;  %v2626_v45 = vmax.f32 %v2128_v48, 0.0  ;;  %v2120_v5 = vadd.f32 %v5575_v50, %v2119_v31 }
 0x2b6   : > { %v5763_v47 = vpop.f32.mrf.mxu0  ;;  %3971 = vmatpush3.msra.mxu1 %v2579_v14  ;;  %6069 = vst [vmem:[#allocation38_spill] sm:$0xff] %v5787_v2 }
 0x2b7   : > { %3068 = vmatmul.mubr.f32.vlgmr.msra.gmra.mxu1 %v2715_v24  ;;  %v2624_v48 = vmax.f32 %v2120_v5, 0.0 }
 0x2b8   : > { %v5767_v30 = vpop.f32.mrf.mxu0  ;;  %3137 = vmatprep.mubr.f32.mxu1 %v2718_v54  ;;  %v5789_v54 = vpop.f32.mrf.mxu1 }
 0x2ba   : > { %v5769_v36 = vpop.f32.mrf.mxu0  ;;  %v5792_v43 = vpop.f32.mrf.mxu1 }
 0x2bb   : > { %6070 = vst [vmem:[#allocation39_spill] sm:$0xff] %v5792_v43  ;;  %v2625_v43 = vmax.f32 %v2125_v41, 0.0 }
 0x2bc   : > { %v5773_v39 = vpop.f32.mrf.mxu0  ;;  %v5799_v2 = vpop.f32.mrf.mxu1 }
 0x2be   : > { %v5775_v26 = vpop.f32.mrf.mxu0 }
 0x2c0   : > { %v5779_v17 = vpop.f32.mrf.mxu0 }
 0x2c2   : > { %v4296_v37 = vpop.f32.mrf.mxu0 }
 0x2c4   : > { %v5783_v38 = vpop.f32.mrf.mxu0 }
 0x2c6   : > { %v4299_v3 = vpop.f32.mrf.mxu0 }
 0x2c8   : > { %v2164_v23 = vpop.f32.mrf.mxu0 }
 0x2ca   : > { %v4300_v59 = vpop.f32.mrf.mxu0 }
 0x2cc   : > { %v2167_v14 = vpop.f32.mrf.mxu0 }
 0x2ce   : > { %v4303_v24 = vpop.f32.mrf.mxu0 }
 0x2cf   : > { %v2189_v44 = vadd.f32 %v5575_v50, %v4303_v24  ;;  %v2117_v24 = vadd.f32 %v5575_v50, %v2116_v62 }
 0x2d0   : > { %v2180_v22 = vpop.f32.mrf.mxu0 }
 0x2d1   : > { %v2641_v42 = vmax.f32 %v2189_v44, 0.0  ;;  %v2181_v4 = vadd.f32 %v5575_v50, %v2180_v22  ;;  %v2173_v44 = vadd.f32 %v5575_v50, %v4299_v3  ;;  %v2109_v22 = vadd.f32 %v5575_v50, %v5727_v15 }
 0x2d2   : > { %v4304_v60 = vpop.f32.mrf.mxu0  ;;  %v2623_v41 = vmax.f32 %v2117_v24, 0.0  ;;  %v2101_v15 = vadd.f32 %v5575_v50, %v5735_v52  ;;  %v2093_v52 = vadd.f32 %v5575_v50, %v5701_v20 }
 0x2d3   : > { %v2192_v9 = vadd.f32 %v5575_v50, %v4304_v60  ;;  %v2176_v60 = vadd.f32 %v5575_v50, %v4300_v59  ;;  %v2639_v31 = vmax.f32 %v2181_v4, 0.0  ;;  %v2637_v5 = vmax.f32 %v2173_v44, 0.0 }
 0x2d4   : > { %v2183_v8 = vpop.f32.mrf.mxu0  ;;  %v2621_v3 = vmax.f32 %v2109_v22, 0.0  ;;  %v2149_v44 = vadd.f32 %v5575_v50, %v5779_v17  ;;  %v2617_v20 = vmax.f32 %v2093_v52, 0.0  ;;  %v2141_v17 = vadd.f32 %v5575_v50, %v5763_v47 }
 0x2d5   : > { %v2642_v57 = vmax.f32 %v2192_v9, 0.0  ;;  %v2184_v28 = vadd.f32 %v5575_v50, %v2183_v8  ;;  %v2112_v8 = vadd.f32 %v5575_v50, %v5741_v58  ;;  %v5806_v9 = vpop.f32.mrf.mxu1  ;;  %v2638_v62 = vmax.f32 %v2176_v60, 0.0 }
 0x2d6   : > { %v2104_v58 = vadd.f32 %v5575_v50, %v5749_v11  ;;  %v2619_v60 = vmax.f32 %v2101_v15, 0.0  ;;  %v2629_v47 = vmax.f32 %v2141_v17, 0.0  ;;  %v2069_v15 = vadd.f32 %v5575_v50, %v5684_v32 }
 0x2d7   : > { %3975 = vmatprep.subr.mxu1 %v2642_v57  ;;  %v2640_v51 = vmax.f32 %v2184_v28, 0.0  ;;  %v2622_v57 = vmax.f32 %v2112_v8, 0.0  ;;  %v2165_v28 = vadd.f32 %v5575_v50, %v2164_v23  ;;  %v2157_v23 = vadd.f32 %v5575_v50, %v5775_v26 }
 0x2d8   : > { %3976 = vmatpush3.msra.mxu1 %v2626_v45  ;;  %v2168_v45 = vadd.f32 %v5575_v50, %v2167_v14  ;;  %v2096_v14 = vadd.f32 %v5575_v50, %v5713_v7  ;;  %v2620_v11 = vmax.f32 %v2104_v58, 0.0  ;;  %v2088_v8 = vadd.f32 %v5575_v50, %v5721_v0 }
 0x2d9   : > { %3977 = vmatprep.subr.mxu1 %v2641_v42  ;;  %v2160_v42 = vadd.f32 %v5575_v50, %v4296_v37  ;;  %v2635_v24 = vmax.f32 %v2165_v28, 0.0  ;;  %v2633_v26 = vmax.f32 %v2157_v23, 0.0  ;;  %v2080_v0 = vadd.f32 %v5575_v50, %v5689_v13 }
 0x2da   : > { %3978 = vmatpush3.msra.mxu1 %v2625_v43  ;;  %v5814_v43 = vpop.f32.mrf.mxu1  ;;  %v2636_v59 = vmax.f32 %v2168_v45, 0.0  ;;  %v2618_v7 = vmax.f32 %v2096_v14, 0.0  ;;  %v2631_v45 = vmax.f32 %v2149_v44, 0.0  ;;  %v2136_v58 = vadd.f32 %v5575_v50, %v5773_v39 }
 0x2db   : > { %3979 = vmatprep.subr.mxu1 %v2640_v51  ;;  %v2634_v37 = vmax.f32 %v2160_v42, 0.0  ;;  %v2152_v51 = vadd.f32 %v5575_v50, %v5783_v38  ;;  %v2144_v38 = vadd.f32 %v5575_v50, %v5769_v36  ;;  %v2614_v13 = vmax.f32 %v2080_v0, 0.0 }
 0x2dc   : > { %3980 = vmatpush3.msra.mxu1 %v2624_v48  ;;  %v5822_v4 = vpop.f32.mrf.mxu1  ;;  %v2628_v42 = vmax.f32 %v2136_v58, 0.0  ;;  %v2320_v39 = vadd.f32 %v5575_v50, %v5668_v40  ;;  %v2611_v23 = vmax.f32 %v2069_v15, 0.0  ;;  %v2253_v32 = vadd.f32 %v5575_v50, %v5540_v61 }
 0x2dd   : > { %3981 = vmatprep.subr.mxu1 %v2639_v31  ;;  %v2085_v31 = vadd.f32 %v5575_v50, %v5708_v46  ;;  %v2632_v22 = vmax.f32 %v2152_v51, 0.0  ;;  %v2077_v46 = vadd.f32 %v5575_v50, %v5678_v21  ;;  %v2630_v36 = vmax.f32 %v2144_v38, 0.0 }
 0x2de   : > { %3982 = vmatpush3.msra.mxu1 %v2623_v41  ;;  %v5832_v48 = vpop.f32.mrf.mxu1  ;;  %v2616_v41 = vmax.f32 %v2088_v8, 0.0  ;;  %v2674_v40 = vmax.f32 %v2320_v39, 0.0  ;;  %v2312_v52 = vadd.f32 %v5575_v50, %v5671_v53  ;;  %v2657_v61 = vmax.f32 %v2253_v32, 0.0  ;;  %v6075_v32 = vld [vmem:[#allocation17_spill] sm:$0xff] }
 0x2df   : > { %3983 = vmatprep.subr.mxu1 %v2638_v62  ;;  %v2613_v21 = vmax.f32 %v2077_v46, 0.0  ;;  %v2245_v8 = vadd.f32 %v5575_v50, %v5542_v10  ;;  %v2304_v53 = vadd.f32 %v5575_v50, %v5656_v18  ;;  %v2237_v10 = vadd.f32 %v5575_v50, %v5518_v25  ;;  %v4307_v25 = vpop.f32.mrf.mxu0 }
 0x2e0   : > { %3984 = vmatpush3.msra.mxu1 %v2622_v57  ;;  %v5842_v62 = vpop.f32.mrf.mxu1  ;;  %v2615_v57 = vmax.f32 %v2085_v31, 0.0  ;;  %v2232_v0 = vadd.f32 %v5575_v50, %v5536_v33  ;;  %v2293_v17 = vadd.f32 %v5575_v50, %v5650_v27  ;;  %v2229_v46 = vadd.f32 %v5575_v50, %v5524_v16  ;;  %v6071_v16 = vld [vmem:[#allocation16_spill] sm:$0xff] }
 0x2e1   : > { %3985 = vmatprep.subr.mxu1 %v2637_v5  ;;  %v2072_v5 = vadd.f32 %v5575_v50, %v5696_v6  ;;  %v2256_v6 = vadd.f32 %v5575_v50, %v5544_v35  ;;  %v2720_v35 = vld [vmem:[#allocation8 + $0x68] sm:$0xff]  ;;  %v2655_v38 = vmax.f32 %v2245_v8, 0.0  ;;  %v2670_v18 = vmax.f32 %v2304_v53, 0.0 }
 0x2e2   : > { %3986 = vmatpush3.msra.mxu1 %v2621_v3  ;;  %v5852_v28 = vpop.f32.mrf.mxu1  ;;  %v2133_v3 = vadd.f32 %v5575_v50, %v5767_v30  ;;  %v2317_v30 = vadd.f32 %v5575_v50, %v5664_v34  ;;  %v2224_v33 = vadd.f32 %v5575_v50, %v5508_v56  ;;  %v2285_v27 = vadd.f32 %v5575_v50, %v5608_v63 }
 0x2e3   : > { %3987 = vmatprep.subr.mxu1 %v2636_v59  ;;  %v2612_v59 = vmax.f32 %v2072_v5, 0.0  ;;  %v2196_v5 = vpop.f32.mrf.mxu0 }
 0x2e4   : > { %3988 = vmatpush3.msra.mxu1 %v2620_v11  ;;  %v5862_v14 = vpop.f32.mrf.mxu1  ;;  %v2627_v11 = vmax.f32 %v2133_v3, 0.0  ;;  %v2673_v34 = vmax.f32 %v2317_v30, 0.0  ;;  %v2651_v3 = vmax.f32 %v2229_v46, 0.0  ;;  %v2650_v56 = vmax.f32 %v2224_v33, 0.0 }
 0x2e5   : > { %3989 = vmatprep.subr.mxu1 %v2635_v24  ;;  %v2717_v24 = vld [vmem:[#allocation8 + $0x50] sm:$0xff]  ;;  %v2665_v63 = vmax.f32 %v2285_v27, 0.0  ;;  %v4308_v30 = vpop.f32.mrf.mxu0  ;;  %v2384_v46 = vadd.f32 %v5575_v50, %v5789_v54  ;;  %v6080_v27 = vld [vmem:[#allocation37_spill] sm:$0xff]  ;;  %v6081_v54 = vld [vmem:[#allocation39_spill] sm:$0xff] }
 0x2e6   : > { %3990 = vmatpush3.msra.mxu1 %v2619_v60  ;;  %v2658_v60 = vmax.f32 %v2256_v6, 0.0  ;;  %v5872_v51 = vpop.f32.mrf.mxu1  ;;  %v6074_v6 = vld [vmem:[#allocation23_spill] sm:$0xff] }
 0x2e7   : > { %3991 = vmatprep.subr.mxu1 %v2634_v37  ;;  %v2248_v37 = vadd.f32 %v5575_v50, %v5547_v1  ;;  %v2240_v1 = vadd.f32 %v5575_v50, %v5530_v55  ;;  %v2199_v53 = vpop.f32.mrf.mxu0 }
 0x2e8   : > { %3992 = vmatpush3.msra.mxu1 %v2618_v7  ;;  %v2309_v7 = vadd.f32 %v5575_v50, %v5666_v49  ;;  %v2301_v49 = vadd.f32 %v5575_v50, %v5644_v19 }
 0x2e9   : > { %3993 = vmatprep.subr.mxu1 %v2633_v26  ;;  %v2672_v26 = vmax.f32 %v2312_v52, 0.0  ;;  %v2656_v44 = vmax.f32 %v2248_v37, 0.0  ;;  %v2654_v55 = vmax.f32 %v2240_v1, 0.0  ;;  %v2208_v37 = vadd.f32 %v5575_v50, %v4308_v30  ;;  %v6083_v30 = vld [vmem:[#allocation35_spill] sm:$0xff] }
 0x2ea   : > { %3994 = vmatpush3.msra.mxu1 %v2617_v20  ;;  %v5882_v20 = vpop.f32.mrf.mxu1  ;;  %v2671_v31 = vmax.f32 %v2309_v7, 0.0  ;;  %v2669_v19 = vmax.f32 %v2301_v49, 0.0  ;;  %v6077_v7 = vld [vmem:[#allocation19_spill] sm:$0xff]  ;;  %v2205_v1 = vadd.f32 %v5575_v50, %v4307_v25  ;;  %v6078_v49 = vld [vmem:[#allocation22_spill] sm:$0xff] }
 0x2eb   : > { %3995 = vmatprep.subr.mxu1 %v2632_v22  ;;  %v2296_v22 = vadd.f32 %v5575_v50, %v5660_v12  ;;  %v2288_v12 = vadd.f32 %v5575_v50, %v5634_v29 }
 0x2ec   : > { %3996 = vmatpush3.msra.mxu1 %v2616_v41  ;;  %v5892_v41 = vpop.f32.mrf.mxu1 }
 0x2ed   : > { %3997 = vmatprep.subr.mxu1 %v2631_v45  ;;  %v2653_v45 = vmax.f32 %v2237_v10, 0.0  ;;  %v2666_v29 = vmax.f32 %v2288_v12, 0.0  ;;  %v2646_v10 = vmax.f32 %v2208_v37, 0.0 }
 0x2ee   : > { %3998 = vmatpush3.msra.mxu1 %v2615_v57  ;;  %v2668_v57 = vmax.f32 %v2296_v22, 0.0  ;;  %v5902_v58 = vpop.f32.mrf.mxu1 }
 0x2ef   : > { %3999 = vmatprep.subr.mxu1 %v2630_v36  ;;  %v2652_v36 = vmax.f32 %v2232_v0, 0.0 }
 0x2f0   : > { %4000 = vmatpush3.msra.mxu1 %v2614_v13  ;;  %v2667_v13 = vmax.f32 %v2293_v17, 0.0  ;;  %v2197_v17 = vadd.f32 %v5575_v50, %v2196_v5  ;;  %v2719_v5 = vld [vmem:[#allocation8 + $0x60] sm:$0xff] }
 0x2f1   : > { %4001 = vmatprep.subr.mxu1 %v2629_v47  ;;  %v2221_v47 = vadd.f32 %v5575_v50, %v6071_v16 }
 0x2f2   : > { %4002 = vmatpush3.msra.mxu1 %v2613_v21  ;;  %v6072_v21 = vld [vmem:[#allocation24_spill] sm:$0xff]  ;;  %v2643_v16 = vmax.f32 %v2197_v17, 0.0 }
 0x2f3   : > { %4003 = vmatprep.subr.mxu1 %v2628_v42  ;;  %v2280_v15 = vadd.f32 %v5575_v50, %v6072_v21  ;;  %v6073_v42 = vld [vmem:[#allocation18_spill] sm:$0xff]  ;;  %v2690_v21 = vmax.f32 %v2384_v46, 0.0 }
 0x2f4   : > { %4004 = vmatpush3.msra.mxu1 %v2612_v59  ;;  %v2216_v39 = vadd.f32 %v5575_v50, %v6073_v42  ;;  %v4367_v59 = vpop.f32.mrf.mxu1 }
 0x2f5   : > { %4005 = vmatprep.subr.mxu1 %v2627_v11  ;;  %v2277_v11 = vadd.f32 %v5575_v50, %v6074_v6  ;;  %v2432_v6 = vadd.f32 %v5575_v50, %v5892_v41  ;;  %v2424_v41 = vadd.f32 %v5575_v50, %v5902_v58  ;;  %v6087_v58 = vld [vmem:[#allocation31_spill] sm:$0xff] }
 0x2f6   : > { %4006 = vmatpush3.msra.mxu1 %v2611_v23  ;;  %v2649_v23 = vmax.f32 %v2221_v47, 0.0 }
 0x2f7   : > { %3138 = vmatmul.mubr.f32.vlgmr.msra.gmra.mxu1 %v2717_v24  ;;  %4010 = vmatprep.subr.mxu1 %v2674_v40  ;;  %v2213_v24 = vadd.f32 %v5575_v50, %v6075_v32  ;;  %v6076_v40 = vld [vmem:[#allocation21_spill] sm:$0xff]  ;;  %v2663_v8 = vmax.f32 %v2277_v11, 0.0  ;;  %v2702_v37 = vmax.f32 %v2432_v6, 0.0 }
 0x2f8   : > { %4011 = vmatpush3.msra.mxu1 %v2658_v60  ;;  %3207 = vmatprep.mubr.f32.mxu1 %v2720_v35  ;;  %v2272_v52 = vadd.f32 %v5575_v50, %v6076_v40  ;;  %v2664_v35 = vmax.f32 %v2280_v15, 0.0  ;;  %v2648_v60 = vmax.f32 %v2216_v39, 0.0  ;;  %v2376_v15 = vadd.f32 %v5575_v50, %v6081_v54 }
 0x2f9   : > { %4012 = vmatprep.subr.mxu1 %v2673_v34  ;;  %v2436_v34 = vpop.f32.mrf.mxu1 }
 0x2fa   : > { %4013 = vmatpush3.msra.mxu1 %v2657_v61  ;;  %v2269_v61 = vadd.f32 %v5575_v50, %v6077_v7  ;;  %v2437_v42 = vadd.f32 %v5575_v50, %v2436_v34  ;;  %v2688_v32 = vmax.f32 %v2376_v15, 0.0  ;;  %v6085_v7 = vld [vmem:[#allocation36_spill] sm:$0xff] }
 0x2fb   : > { %4014 = vmatprep.subr.mxu1 %v2672_v26  ;;  %v2647_v26 = vmax.f32 %v2213_v24, 0.0  ;;  %v2429_v24 = vadd.f32 %v5575_v50, %v5872_v51 }
 0x2fc   : > { %4015 = vmatpush3.msra.mxu1 %v2656_v44  ;;  %v2662_v44 = vmax.f32 %v2272_v52, 0.0  ;;  %v2661_v22 = vmax.f32 %v2269_v61, 0.0  ;;  %v2703_v40 = vmax.f32 %v2437_v42, 0.0  ;;  %v6084_v52 = vld [vmem:[#allocation33_spill] sm:$0xff]  ;;  %v2360_v61 = vadd.f32 %v5575_v50, %v6085_v7 }
 0x2fd   : > { %4016 = vmatprep.subr.mxu1 %v2671_v31  ;;  %v2264_v31 = vadd.f32 %v5575_v50, %v6078_v49 }
 0x2fe   : > { %4017 = vmatpush3.msra.mxu1 %v2655_v38  ;;  %v2200_v38 = vadd.f32 %v5575_v50, %v2199_v53  ;;  %v4654_v53 = vld [vmem:[#allocation7] ss:$0 sm:$0xff] }
 0x2ff   : > { %4018 = vmatprep.subr.mxu1 %v2670_v18  ;;  %v4368_v18 = vpop.f32.mrf.mxu1  ;;  %v2660_v25 = vmax.f32 %v2264_v31, 0.0  ;;  %v2421_v51 = vadd.f32 %v4654_v53, %v5882_v20  ;;  %v2416_v49 = vadd.f32 %v4654_v53, %v5852_v28  ;;  %v2700_v31 = vmax.f32 %v2424_v41, 0.0  ;;  %v6089_v28 = vld [vmem:[#allocation32_spill] sm:$0xff] }
 0x300   : > { %4019 = vmatpush3.msra.mxu1 %v2654_v55  ;;  %v6079_v55 = vld [vmem:[#allocation20_spill] sm:$0xff]  ;;  %v2644_v12 = vmax.f32 %v2200_v38, 0.0  ;;  %v2684_v38 = vmax.f32 %v2360_v61, 0.0  ;;  %v2405_v46 = vadd.f32 %v4654_v53, %v5842_v62  ;;  %v2389_v42 = vadd.f32 %v4654_v53, %v5806_v9 }
 0x301   : > { %4020 = vmatprep.subr.mxu1 %v2669_v19  ;;  %v2261_v0 = vadd.f32 %v5575_v50, %v6079_v55  ;;  %v2645_v19 = vmax.f32 %v2205_v1, 0.0  ;;  %v6086_v1 = vld [vmem:[#allocation34_spill] sm:$0xff] }
 0x302   : > { %4021 = vmatpush3.msra.mxu1 %v2653_v45  ;;  %v2448_v45 = vadd.f32 %v5575_v50, %v4368_v18  ;;  %v2699_v18 = vmax.f32 %v2421_v51, 0.0 }
 0x303   : > { %4022 = vmatprep.subr.mxu1 %v2668_v57  ;;  %v2439_v57 = vpop.f32.mrf.mxu1  ;;  %v2659_v33 = vmax.f32 %v2261_v0, 0.0  ;;  %v2698_v0 = vmax.f32 %v2416_v49, 0.0 }
 0x304   : > { %4023 = vmatpush3.msra.mxu1 %v2652_v36  ;;  %v2445_v36 = vadd.f32 %v5575_v50, %v4367_v59  ;;  %v2706_v47 = vmax.f32 %v2448_v45, 0.0  ;;  %v6082_v59 = vld [vmem:[#allocation38_spill] sm:$0xff] }
 0x305   : > { %4024 = vmatprep.subr.mxu1 %v2667_v13  ;;  %v2381_v13 = vadd.f32 %v5575_v50, %v6080_v27  ;;  %v6091_v27 = vld [vmem:[#allocation27_spill] sm:$0xff] }
 0x306   : > { %4025 = vmatpush3.msra.mxu1 %v2651_v3  ;;  %v2440_v3 = vadd.f32 %v5575_v50, %v2439_v57 }
 0x307   : > { %4026 = vmatprep.subr.mxu1 %v2666_v29  ;;  %v2722_v29 = vld [vmem:[#allocation8 + $0x78] sm:$0xff]  ;;  %v2689_v39 = vmax.f32 %v2381_v13, 0.0  ;;  %v2336_v13 = vadd.f32 %v4654_v53, %v6091_v27 }
 0x308   : > { %4027 = vmatpush3.msra.mxu1 %v2650_v56  ;;  %v2705_v56 = vmax.f32 %v2445_v36, 0.0  ;;  %v2704_v11 = vmax.f32 %v2440_v3, 0.0  ;;  %v3303_v27 = vld [vmem:[#allocation10 + $0x38] sm:$0xff] }
 0x309   : > { %4028 = vmatprep.subr.mxu1 %v2665_v63  ;;  %v2373_v63 = vadd.f32 %v5575_v50, %v6082_v59  ;;  %v2678_v54 = vmax.f32 %v2336_v13, 0.0  ;;  %v3302_v13 = vld [vmem:[#allocation10 + $0x30] sm:$0xff] }
 0x30a   : > { %4029 = vmatpush3.msra.mxu1 %v2649_v23  ;;  %v2368_v23 = vadd.f32 %v5575_v50, %v6083_v30  ;;  %v2721_v30 = vld [vmem:[#allocation8 + $0x70] sm:$0xff] }
 0x30b   : > { %4030 = vmatprep.subr.mxu1 %v2664_v35  ;;  %v2365_v35 = vadd.f32 %v5575_v50, %v6084_v52  ;;  %v2413_v50 = vadd.f32 %v4654_v53, %v5832_v48  ;;  %v6090_v48 = vld [vmem:[#allocation30_spill] sm:$0xff] }
 0x30c   : > { %4031 = vmatpush3.msra.mxu1 %v2648_v60  ;;  %v2687_v60 = vmax.f32 %v2373_v63, 0.0  ;;  %v2686_v34 = vmax.f32 %v2368_v23, 0.0  ;;  %v2341_v57 = vadd.f32 %v4654_v53, %v6090_v48  ;;  %v3832_v23 = vpop.f32.mrf.mxu1  ;;  %v3307_v48 = vld [vmem:[#allocation10 + $0x58] sm:$0xff] }
 0x30d   : > { %4032 = vmatprep.subr.mxu1 %v2663_v8  ;;  %v2701_v8 = vmax.f32 %v2429_v24, 0.0  ;;  %v2697_v45 = vmax.f32 %v2413_v50, 0.0 }
 0x30e   : > { %4033 = vmatpush3.msra.mxu1 %v2647_v26  ;;  %v2685_v26 = vmax.f32 %v2365_v35, 0.0  ;;  %v2679_v62 = vmax.f32 %v2341_v57, 0.0  ;;  %v3306_v57 = vld [vmem:[#allocation10 + $0x50] sm:$0xff] }
 0x30f   : > { %4034 = vmatprep.subr.mxu1 %v2662_v44  ;;  %v2357_v44 = vadd.f32 %v4654_v53, %v6086_v1 }
 0x310   : > { %4035 = vmatpush3.msra.mxu1 %v2646_v10  ;;  %v2352_v10 = vadd.f32 %v4654_v53, %v6087_v58 }
 0x311   : > { %4036 = vmatprep.subr.mxu1 %v2661_v22  ;;  %v6088_v22 = vld [vmem:[#allocation29_spill] sm:$0xff]  ;;  %v2683_v20 = vmax.f32 %v2357_v44, 0.0 }
 0x312   : > { %4037 = vmatpush3.msra.mxu1 %v2645_v19  ;;  %v2349_v55 = vadd.f32 %v4654_v53, %v6088_v22  ;;  %v2408_v19 = vadd.f32 %v4654_v53, %v5862_v14  ;;  %v2682_v17 = vmax.f32 %v2352_v10, 0.0 }
 0x313   : > { %4038 = vmatprep.subr.mxu1 %v2660_v25  ;;  %v2344_v25 = vadd.f32 %v4654_v53, %v6089_v28  ;;  %v4870_v28 = vmov 0.0  }
 0x314   : > { %4039 = vmatpush3.msra.mxu1 %v2644_v12  ;;  %v2681_v12 = vmax.f32 %v2349_v55, 0.0  ;;  %v2696_v36 = vmax.f32 %v2408_v19, 0.0 }
 0x315   : > { %4040 = vmatprep.subr.mxu1 %v2659_v33  ;;  %v2400_v33 = vadd.f32 %v4654_v53, %v5814_v43  ;;  %v2680_v14 = vmax.f32 %v2344_v25, 0.0  ;;  %v6093_v43 = vld [vmem:[#allocation28_spill] sm:$0xff]  ;;  %v3311_v25 = vld [vmem:[#allocation10 + $0x78] sm:$0xff] }
 0x316   : > { %4041 = vmatpush3.msra.mxu1 %v2643_v16  ;;  %v2397_v16 = vadd.f32 %v4654_v53, %v5799_v2  ;;  %v2328_v15 = vadd.f32 %v4654_v53, %v6093_v43  ;;  %v6094_v2 = vld [vmem:[#allocation26_spill] sm:$0xff] }
 0x317   : > { %3208 = vmatmul.mubr.f32.vlgmr.msra.gmra.mxu1 %v2719_v5  ;;  %4045 = vmatprep.subr.mxu1 %v2706_v47  ;;  %v2695_v5 = vmax.f32 %v2405_v46, 0.0  ;;  %v6092_v47 = vld [vmem:[#allocation25_spill] sm:$0xff]  ;;  %v2325_v59 = vadd.f32 %v4654_v53, %v6094_v2  ;;  %v3309_v46 = vld [vmem:[#allocation10 + $0x68] sm:$0xff] }
 0x318   : > { %4046 = vmatpush3.msra.mxu1 %v2690_v21  ;;  %3277 = vmatprep.mubr.f32.mxu1 %v2722_v29  ;;  %v2333_v3 = vadd.f32 %v4654_v53, %v6092_v47  ;;  %v2694_v29 = vmax.f32 %v2400_v33, 0.0  ;;  %v2392_v21 = vadd.f32 %v4654_v53, %v5822_v4  ;;  %v2676_v6 = vmax.f32 %v2328_v15, 0.0  ;;  %v3305_v33 = vld [vmem:[#allocation10 + $0x48] sm:$0xff]  ;;  %v3298_v47 = vld [vmem:[#allocation10 + $0x10] sm:$0xff] }
 0x319   : > { %4047 = vmatprep.subr.mxu1 %v2705_v56  ;;  %v2693_v56 = vmax.f32 %v2397_v16, 0.0  ;;  %v2675_v4 = vmax.f32 %v2325_v59, 0.0  ;;  %v3300_v16 = vld [vmem:[#allocation10 + $0x20] sm:$0xff] }
 0x31a   : > { %4048 = vmatpush3.msra.mxu1 %v2689_v39  ;;  %v2677_v39 = vmax.f32 %v2333_v3, 0.0  ;;  %v2692_v63 = vmax.f32 %v2392_v21, 0.0  ;;  %v3297_v3 = vld [vmem:[#allocation10 + $0x8] sm:$0xff] }
 0x31b   : > { %4049 = vmatprep.subr.mxu1 %v2704_v11  ;;  %v2691_v11 = vmax.f32 %v2389_v42, 0.0 }
 0x31c   : > { %4050 = vmatpush3.msra.mxu1 %v2688_v32  ;;  %v3833_v32 = vpop.f32.mrf.mxu1 }
 0x31d   : > { %4051 = vmatprep.subr.mxu1 %v2703_v40  ;;  %v3834_v7 = vadd.f32 %v3833_v32, %v3832_v23 }
 0x31e   : > { %4052 = vmatpush3.msra.mxu1 %v2687_v60  ;;  %v3867_v9 = vpop.f32.mrf.mxu1 }
 0x31f   : > { %4053 = vmatprep.subr.mxu1 %v2702_v37 }
 0x320   : > { %4054 = vmatpush3.msra.mxu1 %v2686_v34  ;;  %v3868_v24 = vpop.f32.mrf.mxu1 }
 0x321   : > { %4055 = vmatprep.subr.mxu1 %v2701_v8  ;;  %v3869_v61 = vadd.f32 %v3868_v24, %v3867_v9 }
 0x322   : > { %4056 = vmatpush3.msra.mxu1 %v2685_v26  ;;  %v3902_v40 = vpop.f32.mrf.mxu1 }
 0x323   : > { %4057 = vmatprep.subr.mxu1 %v2700_v31  ;;  %v2860_v53 = vadd.f32 %v3869_v61, %v3834_v7 }
 0x324   : > { %4058 = vmatpush3.msra.mxu1 %v2684_v38  ;;  %v3903_v52 = vpop.f32.mrf.mxu1 }
 0x325   : > { %4059 = vmatprep.subr.mxu1 %v2699_v18  ;;  %v3904_v51 = vadd.f32 %v3903_v52, %v3902_v40 }
 0x326   : > { %4060 = vmatpush3.msra.mxu1 %v2683_v20 }
 0x327   : > { %4061 = vmatprep.subr.mxu1 %v2698_v0  ;;  %v2930_v44 = vadd.f32 %v3904_v51, %v2860_v53 }
 0x328   : > { %4062 = vmatpush3.msra.mxu1 %v2682_v17 }
 0x329   : > { %4063 = vmatprep.subr.mxu1 %v2697_v45  ;;  %v3310_v45 = vld [vmem:[#allocation10 + $0x70] sm:$0xff] }
 0x32a   : > { %4064 = vmatpush3.msra.mxu1 %v2681_v12  ;;  %v3308_v12 = vld [vmem:[#allocation10 + $0x60] sm:$0xff] }
 0x32b   : > { %4065 = vmatprep.subr.mxu1 %v2696_v36  ;;  %v3304_v36 = vld [vmem:[#allocation10 + $0x40] sm:$0xff] }
 0x32c   : > { %4066 = vmatpush3.msra.mxu1 %v2680_v14  ;;  %v3301_v14 = vld [vmem:[#allocation10 + $0x28] sm:$0xff] }
 0x32d   : > { %4067 = vmatprep.subr.mxu1 %v2695_v5  ;;  %v3299_v5 = vld [vmem:[#allocation10 + $0x18] sm:$0xff] }
 0x32e   : > { %4068 = vmatpush3.msra.mxu1 %v2679_v62  ;;  %v3296_v62 = vld [vmem:[#allocation10] sm:$0xff] }
 0x32f   : > { %4069 = vmatprep.subr.mxu1 %v2694_v29 }
 0x330   : > { %4070 = vmatpush3.msra.mxu1 %v2678_v54 }
 0x331   : > { %4071 = vmatprep.subr.mxu1 %v2693_v56 }
 0x332   : > { %4072 = vmatpush3.msra.mxu1 %v2677_v39 }
 0x333   : > { %4073 = vmatprep.subr.mxu1 %v2692_v63 }
 0x334   : > { %4074 = vmatpush3.msra.mxu1 %v2676_v6 }
 0x335   : > { %4075 = vmatprep.subr.mxu1 %v2691_v11 }
 0x336   : > { %4076 = vmatpush3.msra.mxu1 %v2675_v4 }
 0x337   : > { %3278 = vmatmul.mubr.f32.vlgmr.msra.gmra.mxu1 %v2721_v30  ;;  %v3937_v35 = vpop.f32.mrf.mxu1  ;;  %4369 = vmatprep.subr.mxu1 %v4870_v28 }
 0x338   : > { %4370 = vmatpush3.msra.mxu1 %v3311_v25  ;;  %4401 = vmatprep.mubr.msk.f32.mxu1 %vm4871_vm0, %v4870_v28 }
 0x339   : > { %v3938_v60 = vpop.f32.mrf.mxu1  ;;  %4371 = vmatprep.subr.mxu1 %v4870_v28 }
 0x33a   : > { %v3939_v1 = vadd.f32 %v3938_v60, %v3937_v35  ;;  %4372 = vmatpush3.msra.mxu1 %v3310_v45 }
 0x33b   : > { %4373 = vmatprep.subr.mxu1 %v4870_v28 }
 0x33c   : > { %v3000_v58 = vadd.f32 %v3939_v1, %v2930_v44  ;;  %4374 = vmatpush3.msra.mxu1 %v3309_v46 }
 0x33d   : > { %4375 = vmatprep.subr.mxu1 %v4870_v28 }
 0x33e   : > { %4376 = vmatpush3.msra.mxu1 %v3308_v12 }
 0x33f   : > { %4377 = vmatprep.subr.mxu1 %v4870_v28 }
 0x340   : > { %4378 = vmatpush3.msra.mxu1 %v3307_v48 }
 0x341   : > { %4379 = vmatprep.subr.mxu1 %v4870_v28 }
 0x342   : > { %4380 = vmatpush3.msra.mxu1 %v3306_v57 }
 0x343   : > { %4381 = vmatprep.subr.mxu1 %v4870_v28 }
 0x344   : > { %4382 = vmatpush3.msra.mxu1 %v3305_v33 }
 0x345   : > { %4383 = vmatprep.subr.mxu1 %v4870_v28 }
 0x346   : > { %4384 = vmatpush3.msra.mxu1 %v3304_v36 }
 0x347   : > { %4385 = vmatprep.subr.mxu1 %v4870_v28 }
 0x348   : > { %4386 = vmatpush3.msra.mxu1 %v3303_v27 }
 0x349   : > { %4387 = vmatprep.subr.mxu1 %v4870_v28 }
 0x34a   : > { %4388 = vmatpush3.msra.mxu1 %v3302_v13 }
 0x34b   : > { %4389 = vmatprep.subr.mxu1 %v4870_v28 }
 0x34c   : > { %4390 = vmatpush3.msra.mxu1 %v3301_v14 }
 0x34d   : > { %4391 = vmatprep.subr.mxu1 %v4870_v28 }
 0x34e   : > { %4392 = vmatpush3.msra.mxu1 %v3300_v16 }
 0x34f   : > { %4393 = vmatprep.subr.mxu1 %v4870_v28 }
 0x350   : > { %4394 = vmatpush3.msra.mxu1 %v3299_v5 }
 0x351   : > { %4395 = vmatprep.subr.mxu1 %v4870_v28 }
 0x352   : > { %4396 = vmatpush3.msra.mxu1 %v3298_v47 }
 0x353   : > { %4397 = vmatprep.subr.mxu1 %v4870_v28 }
 0x354   : > { %4398 = vmatpush3.msra.mxu1 %v3297_v3 }
 0x355   : > { %4399 = vmatprep.subr.mxu1 %v4870_v28 }
 0x356   : > { %4400 = vmatpush3.msra.mxu1 %v3296_v62 }
 0x377   : > { %v3972_v37 = vpop.f32.mrf.mxu1 }
 0x379   : > { %v3973_v41 = vpop.f32.mrf.mxu1 }
 0x37a   : > { %v3974_v49 = vadd.f32 %v3973_v41, %v3972_v37 }
 0x37c   : > { %v3070_v38 = vadd.f32 %v3974_v49, %v3000_v58 }
 0x3b7   : > { %v4007_v34 = vpop.f32.mrf.mxu1 }
 0x3b9   : > { %v4008_v8 = vpop.f32.mrf.mxu1 }
 0x3ba   : > { %v4009_v10 = vadd.f32 %v4008_v8, %v4007_v34 }
 0x3bc   : > { %v3140_v22 = vadd.f32 %v4009_v10, %v3070_v38 }
 0x3d7   : > { %v4042_v26 = vpop.f32.mrf.mxu1 }
 0x3d9   : > { %v4043_v31 = vpop.f32.mrf.mxu1 }
 0x3da   : > { %v4044_v50 = vadd.f32 %v4043_v31, %v4042_v26 }
 0x3dc   : > { %v3210_v20 = vadd.f32 %v4044_v50, %v3140_v22 }
 0x3f7   : > { %v4077_v18 = vpop.f32.mrf.mxu1 }
 0x3f9   : > { %v4078_v55 = vpop.f32.mrf.mxu1 }
 0x3fa   : > { %v4079_v0 = vadd.f32 %v4078_v55, %v4077_v18 }
 0x3fc   : > { %v5970_v19 = vadd.f32 %v4079_v0, %v3210_v20 }
 0x3fe   : > { %v3283_v17 = vmul.f32 %v5970_v19, %v5970_v19 }
 0x400   : > { %3284 = vadd.xlane.f32.xlu0 %v3283_v17 }
 0x489   : > { %v3285_v29 = vpop.xlane.xlu0 %3284 }
 0x48a   : > { %4649 = vrsqrt.f32 %v3285_v29  ;;  %vm3288_vm1 = vcmp.eq.f32.partialorder %v3285_v29, inf  ;;  %v3291_v43 = vand.u32 2147483648, %v3285_v29  ;;  %vm3290_vm2 = vcmp.eq.f32.partialorder %v3285_v29, 0.0 }
 0x497   : > { %v4650_v21 = vpop.eup %4649 }
 0x498   : > { %v3287_v54 = vmul.f32 %v4650_v21, %v3285_v29 }
 0x49a   : > { %v3289_v15 = vsel %vm3288_vm1, %v3285_v29, %v3287_v54 }
 0x49b   : > { %v3292_v56 = vsel %vm3290_vm2, %v3291_v43, %v3289_v15 }
 0x49c   : > { %v3293_v42 = vadd.f32 1e-05, %v3292_v56 }
 0x49e   : > { %4651 = vrcp.f32 %v3293_v42 }
 0x4ab   : > { %v4652_v39 = vpop.eup %4651 }
 0x4ac   : > { %v3295_v2 = vmul.f32 %v4652_v39, %v5970_v19 }
 0x4ae   : > { %4402 = vmatmul.mubr.f32.vlgmr.msra.gmra.mxu1 %v3295_v2 }
 0x56e   : > { %v3378_v59 = vpop.f32.mrf.mxu1 }
 0x56f   : > { %3382 = vst [vmem:[%s296_s26] sm:$0xff] %v3378_v59 }
 0x570   : > { %v4403_v63 = vpop.f32.mrf.mxu1 }
 0x571   : > { %4800 = shalt.err (!%p4797_p9)
}
 0x572   : > { %s4801_s15 = scalar_lea.hbm %s5982_s13, 128  ;;  %s4805_s27 = scalar_lea.hbm %s6027_s5, 512 }
 0x573   : > { %p4802_p6 = scmp.ne.s32.totalorder %s5982_s13, %s4801_s15  ;;  %p4806_p1 = scmp.lt.s32.totalorder %s5982_s13, %s6027_s5 }
 0x574   : > { %p4807_p10 = scmp.lt.s32.totalorder %s4805_s27, %s4801_s15 }
 0x575   : > { %p4803_p4 = pnand %p4802_p6, %p6095_p13 }
 0x576   : > { %p4808_p12 = por %p4807_p10, %p4806_p1 }
 0x577   : > { %p4804_p8 = pneg %p4803_p4 }
 0x579   : > { %p4809_p11 = pnand %p4808_p12, %p4804_p8 }
 0x57b   : > { %4812 = shalt.err (!%p4809_p11)
}
 0x57c   : > { %4438 = dma.vmem_to_hbm [thread:$0]  (%p6095_p13), %s5977_s11, 128, %s5982_s13, %s3384_s6  }
 0x57d PF: > { %p4470_p0 = scmp.ge.s32.totalorder %s4859_s21, 2  ;;  %s3409_s26 = sand.u32 1, %s4847_s18  }
 0x57e   : > { %p6096_p3 = scmp.ne.s32.totalorder %s6034_s25, 0  ;;  %s3410_s7 = scalar_lea.sflag [#allocation4], %s3409_s26 }
 0x580   : > { %p4458_p5 = pnand %p4470_p0, %p6096_p3 }
 0x582   : > { %p4459_p2 = pneg %p4458_p5 }
 0x584   : > { %4842 = dma.done.wait (%p4459_p2), %s3410_s7, 128  }
 0x585   : > { %4844 = vsyncadd (%p4459_p2), %s3410_s7, 4294967168  ;;  %p20_p7 = scmp.ge.s32.totalorder %s4993_s14, 6   ;;  %s6097_s18 = smov %s4851_s19 }
 0x586   : > { %s6098_s19 = smov %s4855_s20  ;;  %s6099_s20 = smov %s5002_s17 }
 0x587   : > { %s6100_s21 = smov %s4993_s14  ;;  %22 = sbr.rel (!%p20_p7) target bundleno = 7 (0x7), region = 101 }
 0x58c   :  { %3415 = vsyncpa [#allocation3], 1 }
 0x58d   :  { %3417 = vsyncpa [#allocation3 + $0x1], 1 }
 0x58e   :  { %3418 = vsyncpa [#allocation6], 1 }
 0x58f   :  { %3419 = vsyncpa [#allocation9], 1 }
 0x590   :  { %3420 = vsyncpa [#allocation4], 1 }
 0x591   :  { %3422 = vsyncpa [#allocation4 + $0x1], 1 }

</bundles_post_ra>
